<compile_context>
chip_gen: v7x
topology: tpu7x:2x2x1
jax: 0.10.0
libtpu: 0.0.40
codegen_flags: <defaults>
</compile_context>

<pallas_src>
import math

import jax
import jax.numpy as jnp
from jax.experimental import pallas as pl
from jax.experimental.pallas import tpu as pltpu

LEAKY_SLOPE = 0.01  # nn.LeakyReLU() default negative_slope


def _round_up(x, m):
    return ((x + m - 1) // m) * m


def _leaky_relu(x):
    # max(x, a*x) == leaky_relu(x) for 0 < a < 1 (2 VALU ops instead of cmp+mul+select)
    return jnp.maximum(x, LEAKY_SLOPE * x)


def _aggregator_kernel(bi_ref, bk_ref, flag_ref,           # scalar-prefetch (SMEM)
                       adj_ref, e_k_ref, e_rows_ref,
                       w1_ref, b1_ref, w2_ref, b2_ref,
                       o_ref, acc_ref):
    """Grid = (row tiles: parallel, contraction tiles over N: arbitrary).

    bi_ref/bk_ref : (nI*nK,) i32  effective adjacency block indices (block-skip schedule)
    flag_ref      : (nI*nK,) i32  1 if this (i,k) block carries nonzero adjacency
    adj_ref       : (tm, tk)      bf16  attention-weighted adjacency tile
    e_k_ref       : (tk, Din_p)   bf16  E rows for this contraction block
    e_rows_ref    : (tm, Din_p)   bf16  E rows of this tile's output nodes
    w1_ref/w2_ref : (Din_p, Dout_p) bf16  W pre-transposed, lane-padded
    b1_ref/b2_ref : (1, Dout_p)   f32
    o_ref         : (tm, Dout_p)
    acc_ref       : (tm, Din_p)   f32 scratch accumulator for N_h
    """
    del bi_ref, bk_ref  # only used inside the index_maps
    i = pl.program_id(0)
    k = pl.program_id(1)
    nk = pl.num_programs(1)

    @pl.when(k == 0)
    def _init():
        acc_ref[...] = jnp.zeros_like(acc_ref)

    # Message passing partial sum: N_h[tile] += A[tile, kblk] @ E[kblk]  (bf16 MXU, f32 acc)
    # Skipped entirely for all-zero adjacency blocks.
    @pl.when(flag_ref[i * nk + k] != 0)
    def _accumulate():
        acc_ref[...] += jnp.dot(adj_ref[...], e_k_ref[...],
                                preferred_element_type=jnp.float32)

    @pl.when(k == nk - 1)
    def _finalize():
        n_h = acc_ref[...]                                   # (tm, Din_p) f32
        e_rows = e_rows_ref[...].astype(jnp.float32)         # (tm, Din_p) f32

        # Sequence the two branches so only one (tm, Din_p) temporary + one (tm, Dout_p)
        # result is live at a time (keeps the epilogue inside the 64-vreg file).
        h1 = jnp.dot((e_rows + n_h).astype(jnp.bfloat16), w1_ref[...],
                     preferred_element_type=jnp.float32) + b1_ref[...]
        o_ref[...] = _leaky_relu(h1).astype(o_ref.dtype)

        h2 = jnp.dot((e_rows * n_h).astype(jnp.bfloat16), w2_ref[...],
                     preferred_element_type=jnp.float32) + b2_ref[...]
        o_ref[...] += _leaky_relu(h2).astype(o_ref.dtype)

        # TODO(synk): training-mode message_dropout would use pltpu.prng_seed +
        # pltpu.stateful_bernoulli; eval mode (identity) is what is matched here.


def _vmem_limit_bytes(tm, tk, din_p, dout_p):
    bf16, f32 = 2, 4
    need = (
        2 * tm * tk * bf16              # adj tile, double-buffered
        + 2 * tk * din_p * bf16         # E contraction block, double-buffered
        + 2 * tm * din_p * bf16         # E row tile, double-buffered
        + 2 * 2 * din_p * dout_p * bf16 # W1^T + W2^T (resident, double-buffered alloc)
        + 2 * 2 * dout_p * f32          # b1 + b2
        + 2 * tm * dout_p * f32         # output tile, double-buffered
        + tm * din_p * f32              # accumulator scratch
    )
    need = int(need * 1.3) + (2 << 20)  # headroom for compiler-internal scratch
    try:
        cap = int(pltpu.get_tpu_info().vmem_capacity_bytes)
    except Exception:
        cap = 64 * 1024 * 1024          # conservative (v7x per-TC physical VMEM)
    return int(min(max(need, 16 * 1024 * 1024), int(cap * 0.8)))


def _build_block_schedule(block_mask, n_i, n_k):
    """Flattened (i-major, k-minor == grid traversal order) block-skip schedule.

    Zero blocks point at the most recently fetched nonzero block so Pallas skips the
    adjacency / E-contraction DMA; `flags` gates the MXU accumulate in-kernel.
    """
    total = n_i * n_k
    if block_mask is None:
        bi = jnp.repeat(jnp.arange(n_i, dtype=jnp.int32), n_k)
        bk = jnp.tile(jnp.arange(n_k, dtype=jnp.int32), n_i)
        flags = jnp.ones((total,), jnp.int32)
        return bi, bk, flags

    m = jnp.asarray(block_mask).reshape(total).astype(bool)
    idx = jnp.arange(total, dtype=jnp.int32)
    marked = jnp.where(m, idx, jnp.int32(-1))
    last = jax.lax.cummax(marked, axis=0)            # most recent nonzero block so far
    eff = jnp.where(last < 0, idx, last)             # before any nonzero: point at self
    return (eff // n_k).astype(jnp.int32), (eff % n_k).astype(jnp.int32), m.astype(jnp.int32)


def aggregator_bi_interaction(adj, entity_embed, w1, b1, w2, b2, *,
                              tm=256, tk=4096,
                              block_mask=None, detect_zero_blocks=False):
    """KGAT 'bi-interaction' aggregator forward (eval mode).

    adj          : (N, N)      attention-weighted dense adjacency (row i = in-edges of node i).
                   Pass it already in bf16 and tile-aligned to avoid any wrapper-side
                   O(N^2) pad/cast pass.
    entity_embed : (N, Din)
    w1, w2       : (Dout, Din) PyTorch nn.Linear layout
    b1, b2       : (Dout,)
    block_mask   : optional (N/tm, N/tk) bool — True where the adjacency block has any
                   nonzero (e.g. produced by the upstream attention step). Zero blocks
                   are skipped (no DMA, no MXU work).
    detect_zero_blocks : compute block_mask from adj in the wrapper (costs one extra
                   O(N^2) read; prefer passing block_mask from upstream).
    returns      : (N, Dout)
    """
    n, din = entity_embed.shape
    dout = w1.shape[0]

    # Validate / round tile sizes for bf16 (16, 128) tiling, clamp to problem size,
    # and force tk to a multiple of tm so n_pad == round_up(n, tk) (minimal padding).
    tm = max(16, _round_up(int(tm), 16))
    tm = min(tm, _round_up(n, 16))
    tk_align = math.lcm(tm, 128)
    tk = max(tk_align, _round_up(int(tk), tk_align))
    tk = min(tk, _round_up(n, tk_align))

    n_pad = _round_up(n, math.lcm(tm, tk))
    din_p = _round_up(din, 128)
    dout_p = _round_up(dout, 128)
    n_i, n_k = n_pad // tm, n_pad // tk

    f32 = jnp.float32
    out_dtype = jnp.asarray(entity_embed).dtype

    # Adjacency: cast/pad only if actually needed (avoid the O(N^2) wrapper pass).
    adj_p = jnp.asarray(adj)
    if adj_p.dtype != jnp.bfloat16:
        adj_p = adj_p.astype(jnp.bfloat16)
    if n_pad != n:
        adj_p = jnp.pad(adj_p, ((0, n_pad - n), (0, n_pad - n)))

    # Single bf16 E table, bound twice (contraction block + row tile).
    e_bf16 = jnp.asarray(entity_embed)
    if e_bf16.dtype != jnp.bfloat16:
        e_bf16 = e_bf16.astype(jnp.bfloat16)
    if n_pad != n or din_p != din:
        e_bf16 = jnp.pad(e_bf16, ((0, n_pad - n), (0, din_p - din)))

    w1_t = jnp.pad(jnp.asarray(w1, f32).T, ((0, din_p - din), (0, dout_p - dout))).astype(jnp.bfloat16)
    w2_t = jnp.pad(jnp.asarray(w2, f32).T, ((0, din_p - din), (0, dout_p - dout))).astype(jnp.bfloat16)
    b1_r = jnp.pad(jnp.asarray(b1, f32).reshape(1, dout), ((0, 0), (0, dout_p - dout)))
    b2_r = jnp.pad(jnp.asarray(b2, f32).reshape(1, dout), ((0, 0), (0, dout_p - dout)))

    if block_mask is None and detect_zero_blocks:
        block_mask = (adj_p.reshape(n_i, tm, n_k, tk) != 0).any(axis=(1, 3))
    if block_mask is not None:
        block_mask = jnp.asarray(block_mask)
        assert block_mask.shape == (n_i, n_k), (block_mask.shape, (n_i, n_k))
    bi, bk, flags = _build_block_schedule(block_mask, n_i, n_k)

    grid = (n_i, n_k)   # (row tiles: parallel / megacore-sharded, contraction: arbitrary)

    out_padded = pl.pallas_call(
        _aggregator_kernel,
        out_shape=jax.ShapeDtypeStruct((n_pad, dout_p), out_dtype),
        grid_spec=pltpu.PrefetchScalarGridSpec(
            num_scalar_prefetch=3,
            grid=grid,
            in_specs=[
                # adjacency tile (bf16): redirected to the last nonzero block when skipped
                pl.BlockSpec((tm, tk),
                             lambda i, k, bi, bk, fl, _nk=n_k: (bi[i * _nk + k],
                                                                bk[i * _nk + k])),
                # E contraction block (bf16): follows the adjacency column block
                pl.BlockSpec((tk, din_p),
                             lambda i, k, bi, bk, fl, _nk=n_k: (bk[i * _nk + k], 0)),
                # E row tile (bf16): only re-fetched when the row tile changes
                pl.BlockSpec((tm, din_p), lambda i, k, bi, bk, fl: (i, 0)),
                pl.BlockSpec((din_p, dout_p), lambda i, k, bi, bk, fl: (0, 0)),   # W1^T
                pl.BlockSpec((1, dout_p), lambda i, k, bi, bk, fl: (0, 0)),       # b1
                pl.BlockSpec((din_p, dout_p), lambda i, k, bi, bk, fl: (0, 0)),   # W2^T
                pl.BlockSpec((1, dout_p), lambda i, k, bi, bk, fl: (0, 0)),       # b2
            ],
            out_specs=pl.BlockSpec((tm, dout_p), lambda i, k, bi, bk, fl: (i, 0)),
            scratch_shapes=[pltpu.VMEM((tm, din_p), jnp.float32)],   # N_h accumulator
        ),
        compiler_params=pltpu.CompilerParams(
            dimension_semantics=("parallel", "arbitrary"),
            vmem_limit_bytes=_vmem_limit_bytes(tm, tk, din_p, dout_p),
        ),
    )(bi, bk, flags, adj_p, e_bf16, e_bf16, w1_t, b1_r, w2_t, b2_r)

    return out_padded[:n, :dout]


def aggregator_reference(adj, entity_embed, w1, b1, w2, b2):
    """Pure-JAX reference mirroring the kernel numerics (bf16 operands, f32 accumulation)."""
    e_bf = entity_embed.astype(jnp.bfloat16)
    n_h = jnp.dot(adj.astype(jnp.bfloat16), e_bf, preferred_element_type=jnp.float32)
    e = e_bf.astype(jnp.float32)
    h1 = jnp.dot((e + n_h).astype(jnp.bfloat16), w1.T.astype(jnp.bfloat16),
                 preferred_element_type=jnp.float32) + b1
    h2 = jnp.dot((e * n_h).astype(jnp.bfloat16), w2.T.astype(jnp.bfloat16),
                 preferred_element_type=jnp.float32) + b2
    return _leaky_relu(h1) + _leaky_relu(h2)


if __name__ == "__main__":
    # Small, deterministic example: 512 graph nodes, in_dim=64, out_dim=64.
    # With tm=tk=256 this exercises a (2, 2) grid: parallel row tiles + K accumulation,
    # plus the block-sparse skip path (one (256, 256) adjacency block is all-zero).
    N, IN_DIM, OUT_DIM = 512, 64, 64
    TM, TK = 256, 256

    key = jax.random.PRNGKey(0)
    k_adj, k_e, k_w1, k_b1, k_w2, k_b2 = jax.random.split(key, 6)

    # Sparse-ish attention adjacency (row i holds attention weights of in-edges of node i).
    adj_dense = jax.random.uniform(k_adj, (N, N), dtype=jnp.float32)
    nz_mask = jax.random.uniform(jax.random.fold_in(k_adj, 1), (N, N)) < 0.2
    adj = jnp.where(nz_mask, adj_dense, 0.0)
    # Carve out an all-zero (TM, TK) block so block skipping is actually exercised.
    adj = adj.at[0:TM, TK:2 * TK].set(0.0)
    # Produce the adjacency in bf16 upstream so the kernel wrapper does no O(N^2) pass.
    adj_bf16 = adj.astype(jnp.bfloat16)

    entity_embed = jax.random.normal(k_e, (N, IN_DIM), dtype=jnp.float32)

    # Deterministic Linear params (PyTorch layout: W is (out_dim, in_dim)).
    w1 = jax.random.normal(k_w1, (OUT_DIM, IN_DIM), dtype=jnp.float32) * 0.1
    b1 = jax.random.normal(k_b1, (OUT_DIM,), dtype=jnp.float32) * 0.1
    w2 = jax.random.normal(k_w2, (OUT_DIM, IN_DIM), dtype=jnp.float32) * 0.1
    b2 = jax.random.normal(k_b2, (OUT_DIM,), dtype=jnp.float32) * 0.1

    ref = aggregator_reference(adj, entity_embed, w1, b1, w2, b2)

    # Dense path.
    out_dense = aggregator_bi_interaction(adj_bf16, entity_embed, w1, b1, w2, b2,
                                          tm=TM, tk=TK)
    out_dense = jax.block_until_ready(out_dense)
    assert out_dense.shape == (N, OUT_DIM)
    assert jnp.allclose(out_dense, ref, atol=3e-2, rtol=3e-2), "dense path mismatch vs reference"

    # Block-sparse skip path.
    out_sparse = aggregator_bi_interaction(adj_bf16, entity_embed, w1, b1, w2, b2,
                                           tm=TM, tk=TK, detect_zero_blocks=True)
    out_sparse = jax.block_until_ready(out_sparse)
    assert jnp.allclose(out_sparse, ref, atol=3e-2, rtol=3e-2), "block-skip path mismatch vs reference"

    print("KERNEL_OK")
</pallas_src>

<mosaic_0001>
module attributes {stable_mosaic.version = 11 : i64} {
  func.func @_aggregator_kernel(%arg0: i32, %arg1: i32, %arg2: memref<4xi32, #tpu.memory_space<smem>>, %arg3: memref<4xi32, #tpu.memory_space<smem>>, %arg4: memref<4xi32, #tpu.memory_space<smem>>, %arg5: memref<256x256xbf16, #tpu.memory_space<vmem>>, %arg6: memref<256x128xbf16, #tpu.memory_space<vmem>>, %arg7: memref<256x128xbf16, #tpu.memory_space<vmem>>, %arg8: memref<128x128xbf16, #tpu.memory_space<vmem>>, %arg9: memref<1x128xf32, #tpu.memory_space<vmem>>, %arg10: memref<128x128xbf16, #tpu.memory_space<vmem>>, %arg11: memref<1x128xf32, #tpu.memory_space<vmem>>, %arg12: memref<256x128xf32, #tpu.memory_space<vmem>>, %arg13: memref<256x128xf32, #tpu.memory_space<vmem>>) attributes {dimension_semantics = [#tpu.dimension_semantics<parallel>, #tpu.dimension_semantics<arbitrary>], iteration_bounds = array<i64: 2, 2>, scalar_prefetch = 3 : i64, scratch_operands = 1 : i64, tpu.core_type = #tpu.core_type<tc>, window_params = [{transform_indices = @transform_0, window_bounds = array<i64: 256, 256>}, {transform_indices = @transform_1, window_bounds = array<i64: 256, 128>}, {transform_indices = @transform_2, window_bounds = array<i64: 256, 128>}, {pipeline_mode = #tpu.pipeline_mode<synchronous>, transform_indices = @transform_3, window_bounds = array<i64: 128, 128>}, {pipeline_mode = #tpu.pipeline_mode<synchronous>, transform_indices = @transform_4, window_bounds = array<i64: 1, 128>}, {pipeline_mode = #tpu.pipeline_mode<synchronous>, transform_indices = @transform_5, window_bounds = array<i64: 128, 128>}, {pipeline_mode = #tpu.pipeline_mode<synchronous>, transform_indices = @transform_6, window_bounds = array<i64: 1, 128>}, {transform_indices = @transform_7, window_bounds = array<i64: 256, 128>}]} {
    %c0_i32 = arith.constant 0 : i32
    %0 = arith.cmpi eq, %arg1, %c0_i32 : i32
    %1 = arith.extui %0 : i1 to i32
    %c0_i32_0 = arith.constant 0 : i32
    %2 = arith.cmpi ne, %1, %c0_i32_0 : i32
    scf.if %2 {
      %cst = arith.constant 0.000000e+00 : f32
      %13 = vector.broadcast %cst : f32 to vector<256x128xf32>
      %c0 = arith.constant 0 : index
      %c0_4 = arith.constant 0 : index
      %14 = vector.load %arg13[%c0, %c0_4] : memref<256x128xf32, #tpu.memory_space<vmem>>, vector<256x128xf32>
      tpu.vector_store %arg13[%c0, %c0_4], %13 {strides = array<i32>} : memref<256x128xf32, #tpu.memory_space<vmem>>, vector<256x128xf32>,
    } else {
    }
    %c2_i32 = arith.constant 2 : i32
    %3 = arith.muli %arg0, %c2_i32 : i32
    %4 = arith.addi %3, %arg1 : i32
    %5 = arith.index_cast %4 : i32 to index
    %6 = memref.load %arg4[%5] : memref<4xi32, #tpu.memory_space<smem>>
    %c0_i32_1 = arith.constant 0 : i32
    %7 = arith.cmpi ne, %6, %c0_i32_1 : i32
    %8 = arith.extui %7 : i1 to i32
    %c0_i32_2 = arith.constant 0 : i32
    %9 = arith.cmpi ne, %8, %c0_i32_2 : i32
    scf.if %9 {
      %c0 = arith.constant 0 : index
      %c0_4 = arith.constant 0 : index
      %13 = vector.load %arg13[%c0, %c0_4] : memref<256x128xf32, #tpu.memory_space<vmem>>, vector<256x128xf32>
      %c0_5 = arith.constant 0 : index
      %c0_6 = arith.constant 0 : index
      %14 = vector.load %arg5[%c0_5, %c0_6] : memref<256x256xbf16, #tpu.memory_space<vmem>>, vector<256x256xbf16>
      %c0_7 = arith.constant 0 : index
      %c0_8 = arith.constant 0 : index
      %15 = vector.load %arg6[%c0_7, %c0_8] : memref<256x128xbf16, #tpu.memory_space<vmem>>, vector<256x128xbf16>
      %cst = arith.constant dense<0.000000e+00> : vector<256x128xf32>
      %16 = tpu.matmul %14, %15, %cst {dimension_numbers = #tpu.dot_dimension_numbers<[1], [0], [0], [1], [0, 0, 1, 1], [], []>} : vector<256x256xbf16>, vector<256x128xbf16>, vector<256x128xf32> -> vector<256x128xf32>
      %17 = arith.addf %13, %16 : vector<256x128xf32>
      %c0_9 = arith.constant 0 : index
      %c0_10 = arith.constant 0 : index
      %18 = vector.load %arg13[%c0_9, %c0_10] : memref<256x128xf32, #tpu.memory_space<vmem>>, vector<256x128xf32>
      tpu.vector_store %arg13[%c0_9, %c0_10], %17 {strides = array<i32>} : memref<256x128xf32, #tpu.memory_space<vmem>>, vector<256x128xf32>,
    } else {
    }
    %c1_i32 = arith.constant 1 : i32
    %10 = arith.cmpi eq, %arg1, %c1_i32 : i32
    %11 = arith.extui %10 : i1 to i32
    %c0_i32_3 = arith.constant 0 : i32
    %12 = arith.cmpi ne, %11, %c0_i32_3 : i32
    scf.if %12 {
      %c0 = arith.constant 0 : index
      %c0_4 = arith.constant 0 : index
      %13 = vector.load %arg13[%c0, %c0_4] : memref<256x128xf32, #tpu.memory_space<vmem>>, vector<256x128xf32>
      %c0_5 = arith.constant 0 : index
      %c0_6 = arith.constant 0 : index
      %14 = vector.load %arg7[%c0_5, %c0_6] : memref<256x128xbf16, #tpu.memory_space<vmem>>, vector<256x128xbf16>
      %15 = arith.extf %14 : vector<256x128xbf16> to vector<256x128xf32>
      %16 = arith.addf %15, %13 : vector<256x128xf32>
      %17 = arith.truncf %16 : vector<256x128xf32> to vector<256x128xbf16>
      %c0_7 = arith.constant 0 : index
      %c0_8 = arith.constant 0 : index
      %18 = vector.load %arg8[%c0_7, %c0_8] : memref<128x128xbf16, #tpu.memory_space<vmem>>, vector<128x128xbf16>
      %cst = arith.constant dense<0.000000e+00> : vector<256x128xf32>
      %19 = tpu.matmul %17, %18, %cst {dimension_numbers = #tpu.dot_dimension_numbers<[1], [0], [0], [1], [0, 0, 1, 1], [], []>} : vector<256x128xbf16>, vector<128x128xbf16>, vector<256x128xf32> -> vector<256x128xf32>
      %c0_9 = arith.constant 0 : index
      %c0_10 = arith.constant 0 : index
      %20 = vector.load %arg9[%c0_9, %c0_10] : memref<1x128xf32, #tpu.memory_space<vmem>>, vector<1x128xf32>
      %21 = vector.broadcast %20 : vector<1x128xf32> to vector<256x128xf32>
      %22 = arith.addf %19, %21 : vector<256x128xf32>
      %cst_11 = arith.constant 0.00999999977 : f32
      %23 = vector.broadcast %cst_11 : f32 to vector<256x128xf32>
      %24 = arith.mulf %23, %22 : vector<256x128xf32>
      %25 = arith.maximumf %22, %24 : vector<256x128xf32>
      %c0_12 = arith.constant 0 : index
      %c0_13 = arith.constant 0 : index
      %26 = vector.load %arg12[%c0_12, %c0_13] : memref<256x128xf32, #tpu.memory_space<vmem>>, vector<256x128xf32>
      tpu.vector_store %arg12[%c0_12, %c0_13], %25 {strides = array<i32>} : memref<256x128xf32, #tpu.memory_space<vmem>>, vector<256x128xf32>,
      %27 = arith.mulf %15, %13 : vector<256x128xf32>
      %28 = arith.truncf %27 : vector<256x128xf32> to vector<256x128xbf16>
      %c0_14 = arith.constant 0 : index
      %c0_15 = arith.constant 0 : index
      %29 = vector.load %arg10[%c0_14, %c0_15] : memref<128x128xbf16, #tpu.memory_space<vmem>>, vector<128x128xbf16>
      %cst_16 = arith.constant dense<0.000000e+00> : vector<256x128xf32>
      %30 = tpu.matmul %28, %29, %cst_16 {dimension_numbers = #tpu.dot_dimension_numbers<[1], [0], [0], [1], [0, 0, 1, 1], [], []>} : vector<256x128xbf16>, vector<128x128xbf16>, vector<256x128xf32> -> vector<256x128xf32>
      %c0_17 = arith.constant 0 : index
      %c0_18 = arith.constant 0 : index
      %31 = vector.load %arg11[%c0_17, %c0_18] : memref<1x128xf32, #tpu.memory_space<vmem>>, vector<1x128xf32>
      %32 = vector.broadcast %31 : vector<1x128xf32> to vector<256x128xf32>
      %33 = arith.addf %30, %32 : vector<256x128xf32>
      %c0_19 = arith.constant 0 : index
      %c0_20 = arith.constant 0 : index
      %34 = vector.load %arg12[%c0_19, %c0_20] : memref<256x128xf32, #tpu.memory_space<vmem>>, vector<256x128xf32>
      %cst_21 = arith.constant 0.00999999977 : f32
      %35 = vector.broadcast %cst_21 : f32 to vector<256x128xf32>
      %36 = arith.mulf %35, %33 : vector<256x128xf32>
      %37 = arith.maximumf %33, %36 : vector<256x128xf32>
      %38 = arith.addf %34, %37 : vector<256x128xf32>
      %c0_22 = arith.constant 0 : index
      %c0_23 = arith.constant 0 : index
      %39 = vector.load %arg12[%c0_22, %c0_23] : memref<256x128xf32, #tpu.memory_space<vmem>>, vector<256x128xf32>
      tpu.vector_store %arg12[%c0_22, %c0_23], %38 {strides = array<i32>} : memref<256x128xf32, #tpu.memory_space<vmem>>, vector<256x128xf32>,
    } else {
    }
    return
  }
  func.func @transform_0(%arg0: i32, %arg1: i32, %arg2: memref<4xi32, #tpu.memory_space<smem>>, %arg3: memref<4xi32, #tpu.memory_space<smem>>, %arg4: memref<4xi32, #tpu.memory_space<smem>>) -> (i32, i32) {
    %c2_i32 = arith.constant 2 : i32
    %0 = arith.muli %arg0, %c2_i32 : i32
    %1 = arith.addi %0, %arg1 : i32
    %2 = arith.index_cast %1 : i32 to index
    %3 = memref.load %arg2[%2] : memref<4xi32, #tpu.memory_space<smem>>
    %c2_i32_0 = arith.constant 2 : i32
    %4 = arith.muli %arg0, %c2_i32_0 : i32
    %5 = arith.addi %4, %arg1 : i32
    %6 = arith.index_cast %5 : i32 to index
    %7 = memref.load %arg3[%6] : memref<4xi32, #tpu.memory_space<smem>>
    %c0_i32 = arith.constant 0 : i32
    return %3, %7 : i32, i32
  }
  func.func @transform_1(%arg0: i32, %arg1: i32, %arg2: memref<4xi32, #tpu.memory_space<smem>>, %arg3: memref<4xi32, #tpu.memory_space<smem>>, %arg4: memref<4xi32, #tpu.memory_space<smem>>) -> (i32, i32) {
    %c2_i32 = arith.constant 2 : i32
    %0 = arith.muli %arg0, %c2_i32 : i32
    %1 = arith.addi %0, %arg1 : i32
    %2 = arith.index_cast %1 : i32 to index
    %3 = memref.load %arg3[%2] : memref<4xi32, #tpu.memory_space<smem>>
    %c0_i32 = arith.constant 0 : i32
    %c0_i32_0 = arith.constant 0 : i32
    return %3, %c0_i32 : i32, i32
  }
  func.func @transform_2(%arg0: i32, %arg1: i32, %arg2: memref<4xi32, #tpu.memory_space<smem>>, %arg3: memref<4xi32, #tpu.memory_space<smem>>, %arg4: memref<4xi32, #tpu.memory_space<smem>>) -> (i32, i32) {
    %c0_i32 = arith.constant 0 : i32
    %c0_i32_0 = arith.constant 0 : i32
    return %arg0, %c0_i32 : i32, i32
  }
  func.func @transform_3(%arg0: i32, %arg1: i32, %arg2: memref<4xi32, #tpu.memory_space<smem>>, %arg3: memref<4xi32, #tpu.memory_space<smem>>, %arg4: memref<4xi32, #tpu.memory_space<smem>>) -> (i32, i32) {
    %c0_i32 = arith.constant 0 : i32
    %c0_i32_0 = arith.constant 0 : i32
    %c0_i32_1 = arith.constant 0 : i32
    return %c0_i32, %c0_i32_0 : i32, i32
  }
  func.func @transform_4(%arg0: i32, %arg1: i32, %arg2: memref<4xi32, #tpu.memory_space<smem>>, %arg3: memref<4xi32, #tpu.memory_space<smem>>, %arg4: memref<4xi32, #tpu.memory_space<smem>>) -> (i32, i32) {
    %c0_i32 = arith.constant 0 : i32
    %c0_i32_0 = arith.constant 0 : i32
    %c0_i32_1 = arith.constant 0 : i32
    return %c0_i32, %c0_i32_0 : i32, i32
  }
  func.func @transform_5(%arg0: i32, %arg1: i32, %arg2: memref<4xi32, #tpu.memory_space<smem>>, %arg3: memref<4xi32, #tpu.memory_space<smem>>, %arg4: memref<4xi32, #tpu.memory_space<smem>>) -> (i32, i32) {
    %c0_i32 = arith.constant 0 : i32
    %c0_i32_0 = arith.constant 0 : i32
    %c0_i32_1 = arith.constant 0 : i32
    return %c0_i32, %c0_i32_0 : i32, i32
  }
  func.func @transform_6(%arg0: i32, %arg1: i32, %arg2: memref<4xi32, #tpu.memory_space<smem>>, %arg3: memref<4xi32, #tpu.memory_space<smem>>, %arg4: memref<4xi32, #tpu.memory_space<smem>>) -> (i32, i32) {
    %c0_i32 = arith.constant 0 : i32
    %c0_i32_0 = arith.constant 0 : i32
    %c0_i32_1 = arith.constant 0 : i32
    return %c0_i32, %c0_i32_0 : i32, i32
  }
  func.func @transform_7(%arg0: i32, %arg1: i32, %arg2: memref<4xi32, #tpu.memory_space<smem>>, %arg3: memref<4xi32, #tpu.memory_space<smem>>, %arg4: memref<4xi32, #tpu.memory_space<smem>>) -> (i32, i32) {
    %c0_i32 = arith.constant 0 : i32
    %c0_i32_0 = arith.constant 0 : i32
    return %arg0, %c0_i32 : i32, i32
  }
}

</mosaic_0001>

<bundles_post_ra>
// kernel: tpu_custom_call.1
= control target key start
LH: loop header
LB: loop body
LE: loop exit
PB: predicated region body
PF: predicated region fallthrough
CT: control target
= control target key end

     0   :  { %s4042_s0 = inlined_call_operand.hbm [shape: s32[4], index: 0, kind: input, shape index: {}]   ;;  %s4043_s3 = inlined_call_operand.hbm [shape: bf16[512,512], index: 3, kind: input, shape index: {}]   ;;  %s4044_s4 = inlined_call_operand.hbm [shape: bf16[512,128], index: 4, kind: input, shape index: {}]   ;;  %s4045_s5 = inlined_call_operand.hbm [shape: bf16[512,128], index: 5, kind: input, shape index: {}]   ;;  %s4046_s6 = inlined_call_operand.hbm [shape: bf16[128,128], index: 6, kind: input, shape index: {}]   ;;  %s4047_s7 = inlined_call_operand.vmem [shape: f32[1,128], index: 7, kind: input, shape index: {}]   ;;  %s4048_s8 = inlined_call_operand.hbm [shape: bf16[128,128], index: 8, kind: input, shape index: {}]   ;;  %s4049_s9 = inlined_call_operand.vmem [shape: f32[1,128], index: 9, kind: input, shape index: {}]   ;;  %s4050_s10 = inlined_call_operand.hbm [shape: f32[512,128], index: 10, kind: output, shape index: {}]   ;;  %s4051_s1 = inlined_call_operand.vmem [shape: s32[4], index: 1, kind: input, shape index: {}]   ;;  %s4052_s2 = inlined_call_operand.vmem [shape: s32[4], index: 2, kind: input, shape index: {}]  }
   0x1   :  { %4082 = sst [smem:[#allocation45_spill]] %s4043_s3  ;;  %s2888_s15 = scalar_lea.hbm %s4042_s0, 16 }
   0x2   :  { %4083 = sst [smem:[#allocation46_spill]] %s4044_s4  ;;  %p2889_p0 = scmp.ne.s32.totalorder %s4042_s0, %s2888_s15 }
   0x3   :  { %4084 = sst [smem:[#allocation47_spill]] %s4045_s5  ;;  %p2892_p1 = scmp.lt.u32.totalorder %s2888_s15, %s4042_s0 }
   0x4   :  { %4085 = sst [smem:[#allocation48_spill]] %s4046_s6 }
   0x5   :  { %4086 = sst [smem:[#allocation49_spill]] %s4047_s7  ;;  %p2894_p2 = pnand %p2892_p1, %p2889_p0 }
   0x6   :  { %4087 = sst [smem:[#allocation50_spill]] %s4048_s8 }
   0x7   :  { %4088 = sst [smem:[#allocation51_spill]] %s4049_s9 }
   0x8   :  { %4089 = sst [smem:[#allocation52_spill]] %s4050_s10 }
   0x9   :  { %2897 = shalt.err (!%p2894_p2)  }
   0xa   :  { %s3230_s20 = smov [#allocation4]   ;;  %s17_s25 = sshll.u32 %s4051_s1, 4  ;;  %s18_s25 = int_to_ptr.vmem [resolvable:$true] %s17_s25 }
   0xb   :  { %16 = dma.hbm_to_smem %s4042_s0, 16, %s3230_s20, [#allocation3] }
   0xc   :  { %s21_s28 = sshll.u32 %s4052_s2, 4  ;;  %s2898_s29 = scalar_lea.vmem %s18_s25, 16  ;;  %s22_s28 = int_to_ptr.vmem [resolvable:$true] %s21_s28 }
   0xd   :  { %p2899_p3 = scmp.ne.s32.totalorder %s18_s25, %s2898_s29  ;;  %p2903_p4 = scmp.lt.s32.totalorder %s18_s25, %s18_s25 }
   0xe   :  { %p2904_p5 = scmp.lt.s32.totalorder %s2898_s29, %s2898_s29 }
  0x10   :  { %p2905_p6 = por %p2904_p5, %p2903_p4 }
  0x12   :  { %p2906_p7 = pnand %p2905_p6, %p2899_p3 }
  0x14   :  { %2909 = shalt.err (!%p2906_p7)  }
  0x15   :  { %s3231_s30 = smov [#allocation5]   ;;  %s2910_s0 = scalar_lea.vmem %s22_s28, 16 }
  0x16   :  { %20 = dma.vmem_to_smem %s18_s25, 16, %s3231_s30, [#allocation3] }
  0x17   :  { %p2911_p8 = scmp.ne.s32.totalorder %s22_s28, %s2910_s0  ;;  %p2915_p9 = scmp.lt.s32.totalorder %s22_s28, %s22_s28 }
  0x18   :  { %p2916_p10 = scmp.lt.s32.totalorder %s2910_s0, %s2910_s0 }
  0x1a   :  { %p2917_p11 = por %p2916_p10, %p2915_p9 }
  0x1c   :  { %p2918_p12 = pnand %p2917_p11, %p2911_p8 }
  0x1e   :  { %2921 = shalt.err (!%p2918_p12)  }
  0x1f   :  { %s3232_s1 = smov [#allocation6]  }
  0x20   :  { %24 = dma.vmem_to_smem %s22_s28, 16, %s3232_s1, [#allocation3] }
  0x21   :  { %3152 = dma.done.wait [#allocation3], 48 }
  0x22   :  { %3153 = vsyncadd [#allocation3], 4294967248 }
  0x23   :  { %26 = sfence }
  0x24   :  { %27 = vsyncpa [#allocation8], 0 }
  0x25   :  { %29 = vsyncpa [#allocation8 + $0x1], 0 }
  0x26   :  { %30 = vsyncpa [#allocation11], 0 }
  0x27   :  { %32 = vsyncpa [#allocation11 + $0x1], 0 }
  0x28   :  { %33 = vsyncpa [#allocation14], 0 }
  0x29   :  { %34 = vsyncpa [#allocation9], 0 }
  0x2a   :  { %36 = vsyncpa [#allocation9 + $0x1], 0  ;;  %s3320_s2 = smov 0   ;;  %s3322_s11 = smov 0  }
  0x2b   :  { %s3324_s12 = smov 0   ;;  %s3326_s13 = smov 0  }
  0x2c   :  { %s3328_s14 = smov 0   ;;  %s3330_s15 = smov 0  }
  0x2d   :  { %s3332_s16 = smov 0   ;;  %s3334_s17 = smov 0  }
  0x2e   :  { %s3336_s18 = smov 0   ;;  %s3338_s19 = smov 0  }
  0x2f   :  { %s3340_s20 = smov 0   ;;  %s3342_s21 = smov 0  }
  0x30   :  { %s3344_s22 = smov 0   ;;  %s3346_s23 = smov 0  }
  0x31 LB: > { %4090 = sst [smem:[#allocation29_spill]] %s3176_s2  ;;  %s3391_s24 = sadd.s32 4294967295, %s3228_s23   ;;  %s3228_s23 = sphi %s3346_s23, %s42_s23   ;;  %s3224_s22 = sphi %s3344_s22, %s4184_s22   ;;  %s3220_s21 = sphi %s3342_s21, %s4183_s21   ;;  %s3216_s20 = sphi %s3340_s20, %s4182_s20   ;;  %s3212_s19 = sphi %s3338_s19, %s4181_s19   ;;  %s3208_s18 = sphi %s3336_s18, %s4180_s18   ;;  %s3204_s17 = sphi %s3334_s17, %s4188_s17   ;;  %s3200_s16 = sphi %s3332_s16, %s4187_s16   ;;  %s3196_s15 = sphi %s3330_s15, %s4178_s15   ;;  %s3192_s14 = sphi %s3328_s14, %s4177_s14   ;;  %s3188_s13 = sphi %s3326_s13, %s4176_s13   ;;  %s3184_s12 = sphi %s3324_s12, %s4186_s12   ;;  %s3180_s11 = sphi %s3322_s11, %s4175_s11   ;;  %s3176_s2 = sphi %s3320_s2, %s4174_s2  }
  0x32   : > { %4091 = sst [smem:[#allocation30_spill]] %s3180_s11  ;;  %p2174_p13 = scmp.ge.s32.totalorder %s3228_s23, 1 }
  0x33   : > { %4092 = sst [smem:[#allocation31_spill]] %s3184_s12  ;;  %p4054_p0 = scmp.eq.s32.totalorder %s3391_s24, 0 }
  0x34   : > { %4093 = sst [smem:[#allocation32_spill]] %s3192_s14  ;;  %p263_p2 = scmp.lt.s32.totalorder %s3228_s23, 5 }
  0x35   : > { %4094 = sst [smem:[#allocation33_spill]] %s3196_s15  ;;  %s3233_s26 = smov [#allocation13]  }
  0x36   : > { %4095 = sst [smem:[#allocation34_spill]] %s3208_s18  ;;  %p3397_p3 = pnand %p2174_p13, %p263_p2 }
  0x37   : > { %4096 = sst [smem:[#allocation35_spill]] %s3212_s19  ;;  %s275_s27 = sshll.u32 %s3233_s26, 4  ;;  %s276_s27 = int_to_ptr.vmem [resolvable:$true] %s275_s27 }
  0x38   : > { %4097 = sst [smem:[#allocation36_spill]] %s3216_s20  ;;  %p2650_p4 = pneg %p3397_p3 }
  0x39   : > { %4098 = sst [smem:[#allocation37_spill]] %s3220_s21  ;;  %s4103_s6 = sld [smem:[#allocation48_spill]] }
  0x3a   : > { %4099 = sst [smem:[#allocation38_spill]] %s3224_s22  ;;  %p3406_p6 = pnand %p2650_p4, %p4054_p0 }
  0x3b   : > { %s4100_s25 = scalar_select %p3397_p3, 1, 0 }
  0x3c   : > { %p2924_p8 = pneg %p3406_p6 }
  0x3d   : > { %4101 = sst [smem:[#allocation39_spill]] %s4100_s25 }
  0x3f   : > { %s2922_s0 = scalar_lea.hbm %s4103_s6, 1024 }
  0x40   : > { %p2923_p7 = scmp.ne.s32.totalorder %s4103_s6, %s2922_s0  ;;  %p2929_p11 = scmp.lt.u32.totalorder %s2922_s0, %s4103_s6 }
  0x42   : > { %p2925_p9 = pnand %p2924_p8, %p2923_p7 }
  0x44   : > { %p2926_p10 = pneg %p2925_p9 }
  0x46   : > { %p2931_p12 = pnand %p2929_p11, %p2926_p10 }
  0x48   : > { %2934 = shalt.err (!%p2931_p12)
}
  0x49   : > { %s2935_s29 = scalar_lea.vmem %s276_s27, 1024  ;;  %p2943_p1 = scmp.lt.s32.totalorder %s276_s27, %s276_s27 }
  0x4a   : > { %p2936_p13 = scmp.ne.s32.totalorder %s276_s27, %s2935_s29  ;;  %p2944_p5 = scmp.lt.s32.totalorder %s2935_s29, %s2935_s29 }
  0x4c   : > { %p2938_p2 = pnand %p2936_p13, %p2924_p8  ;;  %p2945_p0 = por %p2944_p5, %p2943_p1 }
  0x4e   : > { %p2939_p4 = pneg %p2938_p2 }
  0x50   : > { %p2946_p3 = pnand %p2945_p0, %p2939_p4 }
  0x52   : > { %2949 = shalt.err (!%p2946_p3)
}
  0x53   : > { %s4056_s10 = smov 64   ;;  %s4058_s9 = smov 4  }
  0x54   : > { %2653 = dma.hbm_to_vmem [thread:$0]  (!%p3406_p6), %s4103_s6, 1024, %s276_s27, [#allocation14], %s4056_s10, %s4056_s10, %s4058_s9  }
  0x55   : > { %s51_s1 = sadd.s32 1, %s3220_s21  ;;  %s54_s26 = sadd.s32 1, %s3224_s22 }
  0x56   : > { %p52_p0 = scmp.ge.s32.totalorder %s51_s1, 2  ;;  %s2170_s29 = sshll.u32 %s3224_s22, 1 }
  0x57   : > { %p4074_p1 = scmp.eq.s32.totalorder %s3228_s23, 0  ;;  %s3443_s7 = sadd.s32 %s3220_s21, %s2170_s29 }
  0x58   : > { %s4190_s1 = smov (%p52_p0, %s51_s1), 0  ;;  %s4192_s26 = smov (!%p52_p0, %s54_s26), %s3224_s22 }
  0x59   : > { %4104 = sst [smem:[#allocation40_spill]] %s4190_s1  ;;  %s103_s27 = sadd.s32 1, %s3196_s15 }
  0x5a   : > { %p56_p3 = scmp.ge.s32.totalorder %s4192_s26, 2  ;;  %s3447_s30 = sld [smem:[#allocation4 + %s3443_s7]] }
  0x5b   : > { %s3450_s0 = sld [smem:[#allocation5 + %s3443_s7]]  ;;  %p110_p5 = scmp.ne.s32.totalorder %s3196_s15, %s3192_s14 }
  0x5c   : > { %s96_s10 = sld [smem:[#allocation5 + %s3443_s7]]  ;;  %s4194_s26 = smov (%p56_p3, %s4192_s26), 0 }
  0x5d   : > { %4105 = sst [smem:[#allocation41_spill]] %s4194_s26  ;;  %p116_p7 = scmp.ne.s32.totalorder %s3192_s14, %s3188_s13 }
  0x5e   : > { %s2171_s29 = sshll.u32 %s4194_s26, 1  ;;  %p3464_p9 = por %p110_p5, %p4074_p1 }
  0x5f   : > { %s63_s6 = sadd.s32 %s2171_s29, %s4190_s1  ;;  %p4107_p10 = scmp.eq.s32.totalorder %s3391_s24, 0 }
  0x60   : > { %s3468_s20 = sld [smem:[#allocation4 + %s63_s6]]  ;;  %s338_s29 = sand.u32 1, %s3196_s15  }
  0x61   : > { %s3470_s19 = sld [smem:[#allocation5 + %s63_s6]]  ;;  %p3474_p11 = por %p116_p7, %p4107_p10 }
  0x62   : > { %s99_s25 = sld [smem:[#allocation5 + %s63_s6]]  ;;  %s2184_s9 = sshll.u32 %s338_s29, 7 }
  0x63   : > { %s4108_s13 = scalar_select %p3474_p11, 1, 0 }
  0x64   : > { %p4110_p12 = scmp.lt.s32.totalorder %s3228_s23, 4  ;;  %s340_s6 = scalar_lea.vmem [#allocation10], %s2184_s9 }
  0x65   : > { %4109 = sst [smem:[#allocation42_spill]] %s4108_s13  ;;  %s350_s2 = sshll.u32 %s340_s6, 4  ;;  %s3492_s2 = int_to_ptr.vmem [resolvable:$true] %s350_s2 }
  0x66   : > { %p3483_p13 = pnand %p4110_p12, %p3464_p9  ;;  %p4112_p4 = pmov %p4110_p12 }
  0x67   : > { %s2637_s14 = scalar_select %p3464_p9, [#allocation5], [#allocation19] }
  0x68   : > { %s4111_s1 = scalar_select %p3483_p13, 1, 0 }
  0x69   : > { %s2638_s5 = scalar_select %p3464_p9, %s3443_s7, 0 }
  0x6a   : > { %s100_s3 = ssub.s32 %s96_s10, %s99_s25  ;;  %s4196_s14 = smov (!%p4112_p4, %s2637_s14), [#allocation22] }
  0x6b   : > { %p101_p2 = scmp.eq.s32.totalorder %s100_s3, 0  ;;  %p4114_p0 = pmov %p4112_p4 }
  0x6c   : > { %s3236_s13 = smov [#allocation15]   ;;  %s4115_s8 = sld [smem:[#allocation50_spill]] }
  0x6d   : > { %s3497_s29 = scalar_select %p101_p2, %s3196_s15, %s103_s27  }
  0x6e   : > { %s4198_s5 = smov (!%p4114_p0, %s2638_s5), 0  ;;  %s291_s11 = sshll.u32 %s3236_s13, 4  ;;  %s292_s11 = int_to_ptr.vmem [resolvable:$true] %s291_s11 }
  0x6f   : > { %4113 = sst [smem:[#allocation43_spill]] %s3497_s29 }
  0x70   : > { %s343_s12 = sld [smem:[%s4196_s14 + %s4198_s5]] }
  0x72   : > { %s2950_s26 = scalar_lea.hbm %s4115_s8, 1024 }
  0x73   : > { %p2951_p3 = scmp.ne.s32.totalorder %s4115_s8, %s2950_s26  ;;  %p2957_p9 = scmp.lt.u32.totalorder %s2950_s26, %s4115_s8 }
  0x75   : > { %p2953_p5 = pnand %p2951_p3, %p2924_p8 }
  0x77   : > { %p2954_p7 = pneg %p2953_p5 }
  0x79   : > { %p2959_p10 = pnand %p2957_p9, %p2954_p7 }
  0x7b   : > { %2962 = shalt.err (!%p2959_p10)
}
  0x7c   : > { %s2963_s5 = scalar_lea.vmem %s292_s11, 1024  ;;  %p2971_p0 = scmp.lt.s32.totalorder %s292_s11, %s292_s11 }
  0x7d   : > { %p2964_p12 = scmp.ne.s32.totalorder %s292_s11, %s2963_s5  ;;  %p2972_p1 = scmp.lt.s32.totalorder %s2963_s5, %s2963_s5 }
  0x7f   : > { %p2966_p2 = pnand %p2964_p12, %p2924_p8  ;;  %p2973_p11 = por %p2972_p1, %p2971_p0 }
  0x81   : > { %p2967_p4 = pneg %p2966_p2 }
  0x83   : > { %p2974_p13 = pnand %p2973_p11, %p2967_p4 }
  0x85   : > { %2977 = shalt.err (!%p2974_p13)
}
  0x86   : > { %s4116_s14 = smov 4   ;;  %s4117_s22 = smov 64  }
  0x87   : > { %2656 = dma.hbm_to_vmem [thread:$0]  (!%p3406_p6), %s4115_s8, 1024, %s292_s11, [#allocation14], %s4117_s22, %s4117_s22, %s4116_s14  }
  0x88   : > { %s66_s13 = ssub.s32 %s3447_s30, %s3468_s20  ;;  %s67_s6 = ssub.s32 %s3450_s0, %s3470_s19 }
  0x89   : > { %s2274_s21 = sshll.u32 %s343_s12, 11  ;;  %s3528_s25 = sor.u32 %s67_s6, %s66_s13 }
  0x8a   : > { %s4118_s4 = sld [smem:[#allocation46_spill]]  ;;  %p69_p8 = scmp.eq.s32.totalorder %s3528_s25, 0 }
  0x8b   : > { %s4119_s9 = sand.u32 1, %s3228_s23   ;;  %p4120_p1 = scmp.ne.s32.totalorder %s4111_s1, 0 }
  0x8c   : > { %s3538_s5 = scalar_lea.sflag [#allocation11], %s4119_s9 }
  0x8d   : > { %p2980_p11 = pneg %p4120_p1 }
  0x90   : > { %s3533_s3 = scalar_lea.hbm %s4118_s4, %s2274_s21  ;;  %s2983_s20 = scalar_lea.hbm %s4118_s4, 4096 }
  0x91   : > { %s2978_s11 = scalar_lea.hbm %s3533_s3, 2048  ;;  %p2984_p5 = scmp.lt.u32.totalorder %s3533_s3, %s4118_s4 }
  0x92   : > { %p2979_p6 = scmp.ne.s32.totalorder %s3533_s3, %s2978_s11  ;;  %p2985_p7 = scmp.lt.u32.totalorder %s2983_s20, %s2978_s11 }
  0x93   : > { %p2987_p10 = scmp.lt.u32.totalorder %s2978_s11, %s3533_s3 }
  0x94   : > { %p2981_p13 = pnand %p2980_p11, %p2979_p6  ;;  %p2986_p9 = por %p2985_p7, %p2984_p5 }
  0x96   : > { %p2982_p3 = pneg %p2981_p13  ;;  %p2988_p12 = por %p2987_p10, %p2986_p9 }
  0x98   : > { %p2989_p2 = pnand %p2988_p12, %p2982_p3 }
  0x9a   : > { %2992 = shalt.err (!%p2989_p2)
}
  0x9b   : > { %s2993_s26 = scalar_lea.vmem %s3492_s2, 2048  ;;  %s3237_s27 = smov [#allocation10]  }
  0x9c   : > { %p2994_p4 = scmp.ne.s32.totalorder %s3492_s2, %s2993_s26  ;;  %s2998_s13 = sshll.u32 %s3237_s27, 4  ;;  %s2999_s13 = int_to_ptr.vmem [resolvable:$false] %s2998_s13 }
  0x9d   : > { %s3000_s6 = scalar_lea.vmem %s2999_s13, 4096  ;;  %p3001_p13 = scmp.lt.s32.totalorder %s3492_s2, %s2999_s13 }
  0x9e   : > { %p2996_p0 = pnand %p2994_p4, %p2980_p11  ;;  %p3002_p5 = scmp.lt.s32.totalorder %s3000_s6, %s2993_s26 }
  0xa0   : > { %p2997_p6 = pneg %p2996_p0  ;;  %p3003_p7 = por %p3002_p5, %p3001_p13 }
  0xa2   : > { %p3004_p9 = pnand %p3003_p7, %p2997_p6 }
  0xa4   : > { %3007 = shalt.err (!%p3004_p9)
}
  0xa5   : > { %2669 = dma.hbm_to_vmem [thread:$0]  (!%p4120_p1), %s3533_s3, 2048, %s3492_s2, %s3538_s5, %s4117_s22, %s4117_s22, %s4116_s14  }
  0xa6   : > { %s71_s1 = sadd.s32 1, %s3208_s18  ;;  %p78_p11 = scmp.ne.s32.totalorder %s3208_s18, %s3204_s17 }
  0xa7   : > { %s3575_s21 = scalar_select %p69_p8, %s3208_s18, %s71_s1  }
  0xa8   : > { %p4122_p3 = scmp.eq.s32.totalorder %s3228_s23, 0  ;;  %p84_p12 = scmp.ne.s32.totalorder %s3204_s17, %s3200_s16 }
  0xa9   : > { %4121 = sst [smem:[#allocation44_spill]] %s3575_s21  ;;  %s308_s10 = sand.u32 1, %s3208_s18  }
  0xaa   : > { %p3579_p10 = por %p4122_p3, %p78_p11  ;;  %p4124_p2 = scmp.eq.s32.totalorder %s3391_s24, 0 }
  0xab   : > { %s4126_s25 = sld [smem:[#allocation41_spill]]  ;;  %s4127_s3 = sld [smem:[#allocation38_spill]] }
  0xac   : > { %p3588_p1 = por %p4124_p2, %p84_p12  ;;  %s2178_s9 = sshll.u32 %s308_s10, 8 }
  0xad   : > { %p4128_p8 = scmp.lt.s32.totalorder %s3228_s23, 4  ;;  %s4129_s11 = sld [smem:[#allocation31_spill]] }
  0xae   : > { %s4125_s2 = scalar_select %p3588_p1, 1, 0 }
  0xaf   : > { %p3596_p4 = pnand %p4128_p8, %p3579_p10  ;;  %s4200_s7 = smov (!%p3579_p10, %s3443_s7), 0 }
  0xb0   : > { %s2632_s19 = scalar_select %p3579_p10, [#allocation4], [#allocation17] }
  0xb1   : > { %p4131_p0 = pmov %p4128_p8  ;;  %s4133_s16 = sld [smem:[#allocation30_spill]] }
  0xb2   : > { %s2634_s20 = scalar_select %p3579_p10, [#allocation5], [#allocation18] }
  0xb3   : > { %s4202_s19 = smov (!%p4131_p0, %s2632_s19), [#allocation20]  ;;  %p4132_p6 = pmov %p4131_p0 }
  0xb4   : > { %s4134_s30 = sld [smem:[#allocation29_spill]]  ;;  %s312_s26 = scalar_lea.vmem [#allocation7], %s2178_s9 }
  0xb5   : > { %s4204_s7 = smov (!%p4132_p6, %s4200_s7), 0  ;;  %s326_s27 = sshll.u32 %s312_s26, 4  ;;  %s3613_s27 = int_to_ptr.vmem [resolvable:$true] %s326_s27 }
  0xb6   : > { %s315_s0 = sld [smem:[%s4202_s19 + %s4204_s7]]  ;;  %p4135_p13 = pmov %p4131_p0 }
  0xb7   : > { %s2169_s1 = sadd.s32 4294967294, %s3228_s23   ;;  %s126_s4 = ssub.s32 %s4127_s3, %s4126_s25 }
  0xb8   : > { %s4206_s20 = smov (!%p4135_p13, %s2634_s20), [#allocation21]  ;;  %s129_s28 = sadd.s32 1, %s4129_s11 }
  0xb9   : > { %s316_s13 = sld [smem:[%s4206_s20 + %s4204_s7]]  ;;  %p3619_p5 = scmp.eq.s32.totalorder %s126_s4, 0 }
  0xba   : > { %p4079_p7 = scmp.ne.s32.totalorder %s4129_s11, %s4133_s16  ;;  %s4137_s29 = sld [smem:[#allocation45_spill]] }
  0xbb   : > { %p4138_p11 = pmov %p4122_p3  ;;  %s3641_s7 = scalar_lea.sflag [#allocation8], %s308_s10 }
  0xbc   : > { %s2273_s6 = sshll.u32 %s315_s0, 7  ;;  %p3010_p12 = pneg %p3596_p4 }
  0xbd   : > { %p3637_p3 = por %p4079_p7, %p4138_p11 }
  0xbf   : > { %s2181_s8 = sshll.u32 %s316_s13, 1 }
  0xc0   : > { %s323_s9 = sadd.s32 %s2273_s6, %s2181_s8  ;;  %s3013_s20 = scalar_lea.hbm %s4137_s29, 16384 }
  0xc1   : > { %s2183_s19 = sshll.u32 %s323_s9, 6 }
  0xc2   : > { %s3630_s15 = scalar_lea.hbm %s4137_s29, %s2183_s19 }
  0xc3   : > { %s4139_s4 = scalar_select %p3637_p3, 1, 0 }
  0xc4   : > { %s3008_s8 = scalar_lea.hbm %s3630_s15, 4096  ;;  %p3014_p0 = scmp.lt.u32.totalorder %s3630_s15, %s4137_s29 }
  0xc5   : > { %p3009_p10 = scmp.ne.s32.totalorder %s3630_s15, %s3008_s8  ;;  %p3015_p6 = scmp.lt.u32.totalorder %s3013_s20, %s3008_s8 }
  0xc6   : > { %p3017_p11 = scmp.lt.u32.totalorder %s3008_s8, %s3630_s15 }
  0xc7   : > { %p3011_p2 = pnand %p3010_p12, %p3009_p10  ;;  %p3016_p13 = por %p3015_p6, %p3014_p0 }
  0xc9   : > { %p3012_p8 = pneg %p3011_p2  ;;  %p3018_p7 = por %p3017_p11, %p3016_p13 }
  0xcb   : > { %p3019_p9 = pnand %p3018_p7, %p3012_p8 }
  0xcd   : > { %3022 = shalt.err (!%p3019_p9)
}
  0xce   : > { %s3023_s10 = scalar_lea.vmem %s3613_s27, 4096  ;;  %s3238_s6 = smov [#allocation7]  }
  0xcf   : > { %p3024_p10 = scmp.ne.s32.totalorder %s3613_s27, %s3023_s10  ;;  %s3028_s9 = sshll.u32 %s3238_s6, 4  ;;  %s3029_s9 = int_to_ptr.vmem [resolvable:$false] %s3028_s9 }
  0xd0   : > { %s3030_s19 = scalar_lea.vmem %s3029_s9, 8192  ;;  %p3031_p3 = scmp.lt.s32.totalorder %s3613_s27, %s3029_s9 }
  0xd1   : > { %p3026_p2 = pnand %p3024_p10, %p3010_p12  ;;  %p3032_p0 = scmp.lt.s32.totalorder %s3030_s19, %s3023_s10 }
  0xd3   : > { %p3027_p1 = pneg %p3026_p2  ;;  %p3033_p6 = por %p3032_p0, %p3031_p3 }
  0xd5   : > { %p3034_p13 = pnand %p3033_p6, %p3027_p1 }
  0xd7   : > { %3037 = shalt.err (!%p3034_p13)
}
  0xd8   : > { %s3239_s26 = smov 256   ;;  %s3240_s8 = smov 128  }
  0xd9   : > { %s3241_s18 = smov 8   ;;  %p4140_p1 = scmp.eq.s32.totalorder %s3391_s24, 0 }
  0xda   : > { %2664 = dma.hbm_to_vmem [thread:$0]  (!%p3596_p4), %s3630_s15, 4096, %s3613_s27, %s3641_s7, %s3239_s26, %s3240_s8, %s3241_s18  }
  0xdb   : > { %s3674_s25 = scalar_select %p3619_p5, %s4129_s11, %s129_s28  }
  0xdc   : > { %p4141_p7 = scmp.ne.s32.totalorder %s4133_s16, %s4134_s30  ;;  %p4143_p3 = scmp.ne.s32.totalorder %s4129_s11, %s4133_s16 }
  0xdd   : > { %p4144_p12 = scmp.eq.s32.totalorder %s3391_s24, 3  ;;  %p256_p11 = scmp.eq.s32.totalorder %s2169_s1, 3 }
  0xde   : > { %p3681_p9 = por %p4141_p7, %p4140_p1  ;;  %s362_s12 = sand.u32 1, %s4129_s11  }
  0xdf   : > { %p3690_p8 = por %p4144_p12, %p4143_p3  ;;  %s2188_s15 = sshll.u32 %s362_s12, 7 }
  0xe0   : > { %s2275_s27 = sshll.u32 %s4127_s3, 11  ;;  %p4146_p4 = pmov %p4141_p7 }
  0xe1   : > { %s4145_s0 = scalar_select %p3690_p8, 1, 0 }
  0xe2   : > { %p3701_p5 = por %p256_p11, %p4146_p4  ;;  %s4148_s13 = sld [smem:[#allocation47_spill]] }
  0xe3   : > { %s364_s9 = scalar_lea.vmem [#allocation12], %s2188_s15  ;;  %p4150_p10 = scmp.ne.s32.totalorder %s4139_s4, 0 }
  0xe4   : > { %s4147_s21 = scalar_select %p3701_p5, 1, 0 }
  0xe5   : > { %s371_s19 = sshll.u32 %s364_s9, 4  ;;  %p4151_p2 = scmp.lt.s32.totalorder %s3228_s23, 4  ;;  %s3710_s19 = int_to_ptr.vmem [resolvable:$true] %s371_s19 }
  0xe7   : > { %p3716_p0 = pnand %p4151_p2, %p4150_p10 }
  0xe8   : > { %s4149_s10 = smov %s4148_s13  ;;  %s3708_s6 = scalar_lea.hbm %s4148_s13, %s2275_s27 }
  0xe9   : > { %s3038_s11 = scalar_lea.hbm %s3708_s6, 2048  ;;  %p3040_p13 = pneg %p3716_p0 }
  0xea   : > { %p3039_p6 = scmp.ne.s32.totalorder %s3708_s6, %s3038_s11  ;;  %s3043_s1 = scalar_lea.hbm %s4149_s10, 4096 }
  0xeb   : > { %p3044_p3 = scmp.lt.u32.totalorder %s3708_s6, %s4149_s10  ;;  %p3045_p12 = scmp.lt.u32.totalorder %s3043_s1, %s3038_s11 }
  0xec   : > { %p3041_p1 = pnand %p3040_p13, %p3039_p6  ;;  %p3047_p4 = scmp.lt.u32.totalorder %s3038_s11, %s3708_s6 }
  0xed   : > { %p3046_p11 = por %p3045_p12, %p3044_p3 }
  0xee   : > { %p3042_p7 = pneg %p3041_p1 }
  0xef   : > { %p3048_p10 = por %p3047_p4, %p3046_p11 }
  0xf1   : > { %p3049_p2 = pnand %p3048_p10, %p3042_p7 }
  0xf3   : > { %3052 = shalt.err (!%p3049_p2)
}
  0xf4   : > { %s3053_s8 = scalar_lea.vmem %s3710_s19, 2048  ;;  %s3242_s18 = smov [#allocation12]  }
  0xf5   : > { %p3054_p6 = scmp.ne.s32.totalorder %s3710_s19, %s3053_s8  ;;  %s3058_s12 = sshll.u32 %s3242_s18, 4  ;;  %s3059_s12 = int_to_ptr.vmem [resolvable:$false] %s3058_s12 }
  0xf6   : > { %s3060_s15 = scalar_lea.vmem %s3059_s12, 4096  ;;  %p3061_p8 = scmp.lt.s32.totalorder %s3710_s19, %s3059_s12 }
  0xf7   : > { %p3056_p1 = pnand %p3054_p6, %p3040_p13  ;;  %p3062_p3 = scmp.lt.s32.totalorder %s3060_s15, %s3053_s8 }
  0xf9   : > { %p3057_p5 = pneg %p3056_p1  ;;  %p3063_p12 = por %p3062_p3, %p3061_p8 }
  0xfb   : > { %p3064_p11 = pnand %p3063_p12, %p3057_p5 }
  0xfd   : > { %3067 = shalt.err (!%p3064_p11)
}
  0xfe   : > { %2672 = dma.hbm_to_vmem [thread:$0]  (!%p3716_p0), %s3708_s6, 2048, %s3710_s19, %s3538_s5, %s4117_s22, %s4117_s22, %s4116_s14  }
  0xff   : > { %s4153_s27 = sld [smem:[#allocation39_spill]] }
 0x105   : > { %p4154_p13 = scmp.ne.s32.totalorder %s4153_s27, 0 }
 0x106   : > { %s385_s28 = sand.u32 (!%p4154_p13), 1, %s3204_s17   ;;  %p4155_p8 = scmp.ne.s32.totalorder (!%p4154_p13), %s4125_s2, 0 }
 0x107   : > { %383 = sbr.rel (%p4154_p13) target bundleno = 991 (0x3df), region = 48  ;;  %s2192_s7 = sshll.u32 (!%p4154_p13), %s385_s28, 8 }
 0x108   : > { %s386_s13 = scalar_lea.sflag (!%p4154_p13), [#allocation8], %s385_s28  ;;  %s3752_s9 = scalar_lea.vmem (!%p4154_p13), [#allocation7], %s2192_s7 }
 0x10e   : > { %3155 = dma.done.wait (%p4155_p8), %s386_s13, 4096  }
 0x10f   : > { %3157 = vsyncadd (%p4155_p8), %s386_s13, 4294963200  ;;  %s4156_s3 = sld [smem:[#allocation32_spill]]  ;;  %s4157_s11 = sld [smem:[#allocation42_spill]] }
 0x110   : > { %s394_s16 = sand.u32 1, %s3391_s24  }
 0x111   : > { %s395_s5 = scalar_lea.sflag [#allocation11], %s394_s16 }
 0x115   : > { %s396_s14 = sand.u32 1, %s4156_s3   ;;  %p4158_p5 = scmp.ne.s32.totalorder %s4157_s11, 0 }
 0x116   : > { %s2193_s22 = sshll.u32 %s396_s14, 7 }
 0x117   : > { %s3760_s6 = scalar_lea.vmem [#allocation10], %s2193_s22 }
 0x118   : > { %3159 = dma.done.wait (%p4158_p5), %s395_s5, 2048  }
 0x119   : > { %3161 = vsyncadd (%p4158_p5), %s395_s5, 4294965248  ;;  %s4159_s19 = sld [smem:[#allocation30_spill]] }
 0x11f   : > { %s3767_s30 = sand.u32 1, %s4159_s19  }
 0x120   : > { %s2194_s2 = sshll.u32 %s3767_s30, 7 }
 0x121   : > { %s3770_s1 = scalar_lea.vmem [#allocation12], %s2194_s2 }
 0x122   : > { %3163 = dma.done.wait (%p3681_p9), %s395_s5, 2048  }
 0x123   : > { %3165 = vsyncadd (%p3681_p9), %s395_s5, 4294965248  ;;  %p4160_p0 = scmp.eq.s32.totalorder %s3391_s24, 0 }
 0x125   : > { %3167 = dma.done.wait (%p4160_p0), [#allocation14], 2048   ;;  %p4161_p7 = pmov %p4160_p0 }
 0x126   : > { %s2197_s4 = sshll.u32 %s3767_s30, 8  ;;  %s4162_s8 = sld [smem:[#allocation35_spill]] }
 0x127   : > { %3169 = vsyncadd (%p4161_p7), [#allocation14], 4294965248  ;;  %s3781_s26 = scalar_lea.vmem [#allocation16], %s2197_s4 }
 0x12c   : > { %p2198_p4 = scmp.ne.s32.totalorder %s4162_s8, 0 }
 0x12d   : > { %v3243_v0 = vmov (!%p2198_p4), 0.0  }
 0x12e   : > { %472 = sbr.rel (%p2198_p4) target bundleno = 318 (0x13e), region = 72  ;;  %473 = vst [vmem:[#allocation2] sm:$0xff] (!%p2198_p4), %v3243_v0  ;;  %474 = vst [vmem:[#allocation2 + $0x8] sm:$0xff] (!%p2198_p4), %v3243_v0 }
 0x12f   : > { %475 = vst [vmem:[#allocation2 + $0x10] sm:$0xff] (!%p2198_p4), %v3243_v0  ;;  %476 = vst [vmem:[#allocation2 + $0x18] sm:$0xff] (!%p2198_p4), %v3243_v0 }
 0x130   : > { %477 = vst [vmem:[#allocation2 + $0x20] sm:$0xff] (!%p2198_p4), %v3243_v0  ;;  %478 = vst [vmem:[#allocation2 + $0x28] sm:$0xff] (!%p2198_p4), %v3243_v0 }
 0x131   : > { %479 = vst [vmem:[#allocation2 + $0x30] sm:$0xff] (!%p2198_p4), %v3243_v0  ;;  %480 = vst [vmem:[#allocation2 + $0x38] sm:$0xff] (!%p2198_p4), %v3243_v0 }
 0x132   : > { %481 = vst [vmem:[#allocation2 + $0x40] sm:$0xff] (!%p2198_p4), %v3243_v0  ;;  %482 = vst [vmem:[#allocation2 + $0x48] sm:$0xff] (!%p2198_p4), %v3243_v0 }
 0x133   : > { %483 = vst [vmem:[#allocation2 + $0x50] sm:$0xff] (!%p2198_p4), %v3243_v0  ;;  %484 = vst [vmem:[#allocation2 + $0x58] sm:$0xff] (!%p2198_p4), %v3243_v0 }
 0x134   : > { %485 = vst [vmem:[#allocation2 + $0x60] sm:$0xff] (!%p2198_p4), %v3243_v0  ;;  %486 = vst [vmem:[#allocation2 + $0x68] sm:$0xff] (!%p2198_p4), %v3243_v0 }
 0x135   : > { %487 = vst [vmem:[#allocation2 + $0x70] sm:$0xff] %v3243_v0  ;;  %488 = vst [vmem:[#allocation2 + $0x78] sm:$0xff] %v3243_v0 }
 0x136   : > { %489 = vst [vmem:[#allocation2 + $0x80] sm:$0xff] %v3243_v0  ;;  %490 = vst [vmem:[#allocation2 + $0x88] sm:$0xff] %v3243_v0 }
 0x137   : > { %491 = vst [vmem:[#allocation2 + $0x90] sm:$0xff] %v3243_v0  ;;  %492 = vst [vmem:[#allocation2 + $0x98] sm:$0xff] %v3243_v0 }
 0x138   : > { %493 = vst [vmem:[#allocation2 + $0xa0] sm:$0xff] %v3243_v0  ;;  %494 = vst [vmem:[#allocation2 + $0xa8] sm:$0xff] %v3243_v0 }
 0x139   : > { %495 = vst [vmem:[#allocation2 + $0xb0] sm:$0xff] %v3243_v0  ;;  %496 = vst [vmem:[#allocation2 + $0xb8] sm:$0xff] %v3243_v0 }
 0x13a   : > { %497 = vst [vmem:[#allocation2 + $0xc0] sm:$0xff] %v3243_v0  ;;  %498 = vst [vmem:[#allocation2 + $0xc8] sm:$0xff] %v3243_v0 }
 0x13b   : > { %499 = vst [vmem:[#allocation2 + $0xd0] sm:$0xff] %v3243_v0  ;;  %500 = vst [vmem:[#allocation2 + $0xd8] sm:$0xff] %v3243_v0 }
 0x13c   : > { %501 = vst [vmem:[#allocation2 + $0xe0] sm:$0xff] %v3243_v0  ;;  %502 = vst [vmem:[#allocation2 + $0xe8] sm:$0xff] %v3243_v0 }
 0x13d   : > { %503 = vst [vmem:[#allocation2 + $0xf0] sm:$0xff] %v3243_v0  ;;  %504 = vst [vmem:[#allocation2 + $0xf8] sm:$0xff] %v3243_v0 }
 0x13e PF: > { %s4163_s24 = sld [smem:[#allocation36_spill]]  ;;  %s4164_s20 = sld [smem:[#allocation35_spill]] }
 0x144   : > { %s2199_s18 = sshll.u32 %s4163_s24, 1 }
 0x145   : > { %s506_s12 = sadd.s32 %s4164_s20, %s2199_s18 }
 0x146   : > { %s507_s15 = sld [smem:[#allocation6 + %s506_s12]] }
 0x14c   : > { %p2200_p9 = scmp.eq.s32.totalorder %s507_s15, 0 }
 0x14d   : > { %v2808_v1 = vld [vmem:[%s3760_s6 + $0x40] sm:$0xff] (!%p2200_p9)   ;;  %v2810_v3 = vld [vmem:[%s3760_s6 + $0x48] sm:$0xff] (!%p2200_p9)   ;;  %v2812_v5 = vld [vmem:[%s3760_s6 + $0x50] sm:$0xff] (!%p2200_p9)  }
 0x14e   : > { %511 = sbr.rel (%p2200_p9) target bundleno = 642 (0x282), region = 76  ;;  %v2809_v2 = vld [vmem:[%s3760_s6] sm:$0xff] (!%p2200_p9)   ;;  %2356 = vmatprep.subr.bf16.mxu0 (!%p2200_p9), %v2808_v1  ;;  %2612 = vmatprep.subr.bf16.mxu1 (!%p2200_p9), %v2808_v1  ;;  %v2811_v4 = vld [vmem:[%s3760_s6 + $0x8] sm:$0xff] (!%p2200_p9)   ;;  %v2813_v6 = vld [vmem:[%s3760_s6 + $0x10] sm:$0xff] (!%p2200_p9)  }
 0x14f   : > { %2357 = vmatpush3.bf16.msra.mxu0 (!%p2200_p9), %v2809_v2  ;;  %2620 = vmatpush3.bf16.msra.mxu1 (!%p2200_p9), %v2809_v2  ;;  %v2814_v7 = vld [vmem:[%s3760_s6 + $0x58] sm:$0xff] (!%p2200_p9)   ;;  %v2816_v9 = vld [vmem:[%s3760_s6 + $0x60] sm:$0xff] (!%p2200_p9)   ;;  %v2818_v11 = vld [vmem:[%s3760_s6 + $0x68] sm:$0xff] (!%p2200_p9)  }
 0x150   : > { %2358 = vmatprep.subr.bf16.mxu0 (!%p2200_p9), %v2810_v3  ;;  %2613 = vmatprep.subr.bf16.mxu1 (!%p2200_p9), %v2810_v3  ;;  %v2815_v8 = vld [vmem:[%s3760_s6 + $0x18] sm:$0xff] (!%p2200_p9)   ;;  %v2817_v10 = vld [vmem:[%s3760_s6 + $0x20] sm:$0xff] (!%p2200_p9)   ;;  %v2819_v14 = vld [vmem:[%s3760_s6 + $0x28] sm:$0xff] (!%p2200_p9)  }
 0x151   : > { %v2826_v12 = vld [vmem:[%s3752_s9 + $0x4] ss:$8 sps:$4 sm:$0xff] (!%p2200_p9)   ;;  %v2820_v15 = vld [vmem:[%s3760_s6 + $0x70] sm:$0xff] (!%p2200_p9)   ;;  %v2822_v17 = vld [vmem:[%s3760_s6 + $0x78] sm:$0xff] (!%p2200_p9)  }
 0x152   : > { %v2829_v13 = vld [vmem:[%s3752_s9 + $0x84] ss:$8 sps:$4 sm:$0xff] (!%p2200_p9)   ;;  %896 = vmatprep.mubr.bf16.mxu0 (!%p2200_p9), %v2826_v12  ;;  %v2821_v16 = vld [vmem:[%s3760_s6 + $0x30] sm:$0xff] (!%p2200_p9)   ;;  %v2823_v18 = vld [vmem:[%s3760_s6 + $0x38] sm:$0xff] (!%p2200_p9)  }
 0x153   : > { %2359 = vmatpush3.bf16.msra.mxu0 (!%p2200_p9), %v2811_v4  ;;  %2621 = vmatpush3.bf16.msra.mxu1 (!%p2200_p9), %v2811_v4  ;;  %v2824_v19 = vld [vmem:[%s3752_s9] ss:$8 sps:$4 sm:$0xff] (!%p2200_p9)   ;;  %v2830_v21 = vld [vmem:[%s3752_s9 + $0x14] ss:$8 sps:$4 sm:$0xff] (!%p2200_p9)   ;;  %v2834_v23 = vld [vmem:[%s3752_s9 + $0x10] ss:$8 sps:$4 sm:$0xff] (!%p2200_p9)  }
 0x154   : > { %2360 = vmatprep.subr.bf16.mxu0 (!%p2200_p9), %v2812_v5  ;;  %2614 = vmatprep.subr.bf16.mxu1 (!%p2200_p9), %v2812_v5  ;;  %v2827_v20 = vld [vmem:[%s3752_s9 + $0x80] ss:$8 sps:$4 sm:$0xff] (!%p2200_p9)   ;;  %v2832_v22 = vld [vmem:[%s3752_s9 + $0x94] ss:$8 sps:$4 sm:$0xff] (!%p2200_p9)   ;;  %v2835_v24 = vld [vmem:[%s3752_s9 + $0x90] ss:$8 sps:$4 sm:$0xff] (!%p2200_p9)  }
 0x155   : > { %960 = vmatprep.mubr.bf16.mxu1 %v2829_v13  ;;  %v2836_v25 = vld [vmem:[%s3752_s9 + $0x24] ss:$8 sps:$4 sm:$0xff]   ;;  %v2840_v27 = vld [vmem:[%s3752_s9 + $0x20] ss:$8 sps:$4 sm:$0xff]   ;;  %v2842_v29 = vld [vmem:[%s3752_s9 + $0x34] ss:$8 sps:$4 sm:$0xff]  }
 0x156   : > { %v2838_v26 = vld [vmem:[%s3752_s9 + $0xa4] ss:$8 sps:$4 sm:$0xff]   ;;  %v2841_v28 = vld [vmem:[%s3752_s9 + $0xa0] ss:$8 sps:$4 sm:$0xff]   ;;  %v2844_v30 = vld [vmem:[%s3752_s9 + $0xb4] ss:$8 sps:$4 sm:$0xff]  }
 0x157   : > { %2361 = vmatpush3.bf16.msra.mxu0 %v2813_v6  ;;  %2622 = vmatpush3.bf16.msra.mxu1 %v2813_v6  ;;  %v2846_v31 = vld [vmem:[%s3752_s9 + $0x30] ss:$8 sps:$4 sm:$0xff]   ;;  %v2848_v33 = vld [vmem:[%s3752_s9 + $0x44] ss:$8 sps:$4 sm:$0xff]   ;;  %v2852_v35 = vld [vmem:[%s3752_s9 + $0x40] ss:$8 sps:$4 sm:$0xff]  }
 0x158   : > { %2362 = vmatprep.subr.bf16.mxu0 %v2814_v7  ;;  %2615 = vmatprep.subr.bf16.mxu1 %v2814_v7  ;;  %v2847_v32 = vld [vmem:[%s3752_s9 + $0xb0] ss:$8 sps:$4 sm:$0xff]   ;;  %v2850_v34 = vld [vmem:[%s3752_s9 + $0xc4] ss:$8 sps:$4 sm:$0xff]   ;;  %v2853_v36 = vld [vmem:[%s3752_s9 + $0xc0] ss:$8 sps:$4 sm:$0xff]  }
 0x159   : > { %v2854_v37 = vld [vmem:[%s3752_s9 + $0x54] ss:$8 sps:$4 sm:$0xff]   ;;  %v2858_v39 = vld [vmem:[%s3752_s9 + $0x50] ss:$8 sps:$4 sm:$0xff]   ;;  %v2860_v41 = vld [vmem:[%s3752_s9 + $0x64] ss:$8 sps:$4 sm:$0xff]  }
 0x15a   : > { %v2856_v38 = vld [vmem:[%s3752_s9 + $0xd4] ss:$8 sps:$4 sm:$0xff]   ;;  %v2859_v40 = vld [vmem:[%s3752_s9 + $0xd0] ss:$8 sps:$4 sm:$0xff]   ;;  %v2862_v42 = vld [vmem:[%s3752_s9 + $0xe4] ss:$8 sps:$4 sm:$0xff]  }
 0x15b   : > { %2363 = vmatpush3.bf16.msra.mxu0 %v2815_v8  ;;  %2623 = vmatpush3.bf16.msra.mxu1 %v2815_v8  ;;  %v2864_v43 = vld [vmem:[%s3752_s9 + $0x60] ss:$8 sps:$4 sm:$0xff]   ;;  %v2866_v45 = vld [vmem:[%s3752_s9 + $0x74] ss:$8 sps:$4 sm:$0xff]   ;;  %v2870_v47 = vld [vmem:[%s3752_s9 + $0x70] ss:$8 sps:$4 sm:$0xff]  }
 0x15c   : > { %2364 = vmatprep.subr.bf16.mxu0 %v2816_v9  ;;  %2616 = vmatprep.subr.bf16.mxu1 %v2816_v9  ;;  %v2865_v44 = vld [vmem:[%s3752_s9 + $0xe0] ss:$8 sps:$4 sm:$0xff]   ;;  %v2868_v46 = vld [vmem:[%s3752_s9 + $0xf4] ss:$8 sps:$4 sm:$0xff]   ;;  %v2871_v48 = vld [vmem:[%s3752_s9 + $0xf0] ss:$8 sps:$4 sm:$0xff]  }
 0x15d   : > { %v512_v51 = vld [vmem:[#allocation2] sm:$0xff]  ;;  %v513_v59 = vld [vmem:[#allocation2 + $0x8] sm:$0xff]  ;;  %v514_v7 = vld [vmem:[#allocation2 + $0x10] sm:$0xff] }
 0x15e   : > { %v528_v53 = vld [vmem:[#allocation2 + $0x80] sm:$0xff]  ;;  %v529_v61 = vld [vmem:[#allocation2 + $0x88] sm:$0xff]  ;;  %v530_v9 = vld [vmem:[#allocation2 + $0x90] sm:$0xff] }
 0x15f   : > { %2365 = vmatpush3.bf16.msra.mxu0 %v2817_v10  ;;  %2624 = vmatpush3.bf16.msra.mxu1 %v2817_v10 }
 0x160   : > { %2366 = vmatprep.subr.bf16.mxu0 %v2818_v11  ;;  %2617 = vmatprep.subr.bf16.mxu1 %v2818_v11 }
 0x163   : > { %2367 = vmatpush3.bf16.msra.mxu0 %v2819_v14  ;;  %2625 = vmatpush3.bf16.msra.mxu1 %v2819_v14 }
 0x164   : > { %2368 = vmatprep.subr.bf16.mxu0 %v2820_v15  ;;  %2618 = vmatprep.subr.bf16.mxu1 %v2820_v15  ;;  %v515_v15 = vld [vmem:[#allocation2 + $0x18] sm:$0xff] }
 0x167   : > { %2369 = vmatpush3.bf16.msra.mxu0 %v2821_v16  ;;  %2626 = vmatpush3.bf16.msra.mxu1 %v2821_v16 }
 0x168   : > { %2370 = vmatprep.subr.bf16.mxu0 %v2822_v17  ;;  %2619 = vmatprep.subr.bf16.mxu1 %v2822_v17  ;;  %v531_v17 = vld [vmem:[#allocation2 + $0x98] sm:$0xff] }
 0x16b   : > { %2371 = vmatpush3.bf16.msra.mxu0 %v2823_v18  ;;  %2627 = vmatpush3.bf16.msra.mxu1 %v2823_v18 }
 0x16e   : > { %897 = vmatmul.mubr.bf16.vlgmr.msra.gmra.mrb[0].mxu0 %v2824_v19  ;;  %961 = vmatmul.mubr.bf16.vlgmr.msra.gmra.mrb[0].mxu1 %v2827_v20 }
 0x16f   : > { %904 = vmatprep.mubr.bf16.mxu0 %v2830_v21  ;;  %968 = vmatprep.mubr.bf16.mxu1 %v2832_v22 }
 0x176   : > { %905 = vmatmul.mubr.bf16.gmra.mrb[4].mxu0 %v2834_v23  ;;  %969 = vmatmul.mubr.bf16.gmra.mrb[4].mxu1 %v2835_v24 }
 0x177   : > { %912 = vmatprep.mubr.bf16.mxu0 %v2836_v25  ;;  %976 = vmatprep.mubr.bf16.mxu1 %v2838_v26 }
 0x17e   : > { %913 = vmatmul.mubr.bf16.gmra.mrb[8].mxu0 %v2840_v27  ;;  %977 = vmatmul.mubr.bf16.gmra.mrb[8].mxu1 %v2841_v28  ;;  %v516_v27 = vld [vmem:[#allocation2 + $0x20] sm:$0xff] }
 0x17f   : > { %920 = vmatprep.mubr.bf16.mxu0 %v2842_v29  ;;  %984 = vmatprep.mubr.bf16.mxu1 %v2844_v30  ;;  %v532_v29 = vld [vmem:[#allocation2 + $0xa0] sm:$0xff] }
 0x186   : > { %921 = vmatmul.mubr.bf16.gmra.mrb[12].mxu0 %v2846_v31  ;;  %985 = vmatmul.mubr.bf16.gmra.mrb[12].mxu1 %v2847_v32 }
 0x187   : > { %928 = vmatprep.mubr.bf16.mxu0 %v2848_v33  ;;  %992 = vmatprep.mubr.bf16.mxu1 %v2850_v34 }
 0x18e   : > { %929 = vmatmul.mubr.bf16.gmra.mrb[16].mxu0 %v2852_v35  ;;  %993 = vmatmul.mubr.bf16.gmra.mrb[16].mxu1 %v2853_v36  ;;  %v517_v35 = vld [vmem:[#allocation2 + $0x28] sm:$0xff] }
 0x18f   : > { %936 = vmatprep.mubr.bf16.mxu0 %v2854_v37  ;;  %1000 = vmatprep.mubr.bf16.mxu1 %v2856_v38  ;;  %v533_v37 = vld [vmem:[#allocation2 + $0xa8] sm:$0xff] }
 0x196   : > { %937 = vmatmul.mubr.bf16.gmra.mrb[20].mxu0 %v2858_v39  ;;  %1001 = vmatmul.mubr.bf16.gmra.mrb[20].mxu1 %v2859_v40 }
 0x197   : > { %944 = vmatprep.mubr.bf16.mxu0 %v2860_v41  ;;  %1008 = vmatprep.mubr.bf16.mxu1 %v2862_v42 }
 0x19e   : > { %945 = vmatmul.mubr.bf16.gmra.mrb[24].mxu0 %v2864_v43  ;;  %1009 = vmatmul.mubr.bf16.gmra.mrb[24].mxu1 %v2865_v44 }
 0x19f   : > { %952 = vmatprep.mubr.bf16.mxu0 %v2866_v45  ;;  %1016 = vmatprep.mubr.bf16.mxu1 %v2868_v46 }
 0x1a6   : > { %953 = vmatmul.mubr.bf16.gmra.mrb[28].mxu0 %v2870_v47  ;;  %1017 = vmatmul.mubr.bf16.gmra.mrb[28].mxu1 %v2871_v48  ;;  %v518_v47 = vld [vmem:[#allocation2 + $0x30] sm:$0xff] }
 0x241   : > { %v2372_v49 = vpop.f32.mrb[0].mxu0  ;;  %v2420_v50 = vpop.f32.mrb[0].mxu1 }
 0x242   : > { %v2373_v52 = vpop.f32.mrb[1].mxu0  ;;  %v2421_v54 = vpop.f32.mrb[1].mxu1 }
 0x243   : > { %v2374_v55 = vadd.f32 %v2373_v52, %v2372_v49  ;;  %v2422_v56 = vadd.f32 %v2421_v54, %v2420_v50  ;;  %v2375_v57 = vpop.f32.mrb[2].mxu0  ;;  %v2423_v58 = vpop.f32.mrb[2].mxu1  ;;  %v534_v49 = vld [vmem:[#allocation2 + $0xb0] sm:$0xff] }
 0x244   : > { %v2376_v60 = vpop.f32.mrb[3].mxu0  ;;  %v2424_v62 = vpop.f32.mrb[3].mxu1 }
 0x245   : > { %v1025_v63 = vadd.f32 %v2374_v55, %v512_v51  ;;  %v1041_v0 = vadd.f32 %v2422_v56, %v528_v53  ;;  %v2377_v1 = vadd.f32 %v2376_v60, %v2375_v57  ;;  %v2425_v2 = vadd.f32 %v2424_v62, %v2423_v58  ;;  %v519_v55 = vld [vmem:[#allocation2 + $0x38] sm:$0xff] }
 0x246   : > { %v535_v57 = vld [vmem:[#allocation2 + $0xb8] sm:$0xff] }
 0x247   : > { %1057 = vst [vmem:[#allocation2] sm:$0xff] %v1025_v63  ;;  %1073 = vst [vmem:[#allocation2 + $0x80] sm:$0xff] %v1041_v0  ;;  %v1026_v3 = vadd.f32 %v2377_v1, %v513_v59  ;;  %v1042_v4 = vadd.f32 %v2425_v2, %v529_v61 }
 0x249   : > { %1058 = vst [vmem:[#allocation2 + $0x8] sm:$0xff] %v1026_v3  ;;  %1074 = vst [vmem:[#allocation2 + $0x88] sm:$0xff] %v1042_v4  ;;  %v2378_v5 = vpop.f32.mrb[4].mxu0  ;;  %v2426_v6 = vpop.f32.mrb[4].mxu1  ;;  %v520_v3 = vld [vmem:[#allocation2 + $0x40] sm:$0xff] }
 0x24a   : > { %v2379_v8 = vpop.f32.mrb[5].mxu0  ;;  %v2427_v10 = vpop.f32.mrb[5].mxu1 }
 0x24b   : > { %v2380_v11 = vadd.f32 %v2379_v8, %v2378_v5  ;;  %v2428_v12 = vadd.f32 %v2427_v10, %v2426_v6  ;;  %v2381_v13 = vpop.f32.mrb[6].mxu0  ;;  %v2429_v14 = vpop.f32.mrb[6].mxu1  ;;  %v536_v5 = vld [vmem:[#allocation2 + $0xc0] sm:$0xff] }
 0x24c   : > { %v2382_v16 = vpop.f32.mrb[7].mxu0  ;;  %v2430_v18 = vpop.f32.mrb[7].mxu1 }
 0x24d   : > { %v1027_v19 = vadd.f32 %v2380_v11, %v514_v7  ;;  %v1043_v20 = vadd.f32 %v2428_v12, %v530_v9  ;;  %v2383_v21 = vadd.f32 %v2382_v16, %v2381_v13  ;;  %v2431_v22 = vadd.f32 %v2430_v18, %v2429_v14  ;;  %v521_v11 = vld [vmem:[#allocation2 + $0x48] sm:$0xff] }
 0x24e   : > { %v537_v13 = vld [vmem:[#allocation2 + $0xc8] sm:$0xff] }
 0x24f   : > { %1059 = vst [vmem:[#allocation2 + $0x10] sm:$0xff] %v1027_v19  ;;  %1075 = vst [vmem:[#allocation2 + $0x90] sm:$0xff] %v1043_v20  ;;  %v1028_v23 = vadd.f32 %v2383_v21, %v515_v15  ;;  %v1044_v24 = vadd.f32 %v2431_v22, %v531_v17 }
 0x251   : > { %1060 = vst [vmem:[#allocation2 + $0x18] sm:$0xff] %v1028_v23  ;;  %1076 = vst [vmem:[#allocation2 + $0x98] sm:$0xff] %v1044_v24  ;;  %v2384_v25 = vpop.f32.mrb[8].mxu0  ;;  %v2432_v26 = vpop.f32.mrb[8].mxu1  ;;  %v522_v23 = vld [vmem:[#allocation2 + $0x50] sm:$0xff] }
 0x252   : > { %v2385_v28 = vpop.f32.mrb[9].mxu0  ;;  %v2433_v30 = vpop.f32.mrb[9].mxu1 }
 0x253   : > { %v2386_v31 = vadd.f32 %v2385_v28, %v2384_v25  ;;  %v2434_v32 = vadd.f32 %v2433_v30, %v2432_v26  ;;  %v2387_v33 = vpop.f32.mrb[10].mxu0  ;;  %v2435_v34 = vpop.f32.mrb[10].mxu1  ;;  %v538_v25 = vld [vmem:[#allocation2 + $0xd0] sm:$0xff] }
 0x254   : > { %v2388_v36 = vpop.f32.mrb[11].mxu0  ;;  %v2436_v38 = vpop.f32.mrb[11].mxu1 }
 0x255   : > { %v1029_v39 = vadd.f32 %v2386_v31, %v516_v27  ;;  %v1045_v40 = vadd.f32 %v2434_v32, %v532_v29  ;;  %v2389_v41 = vadd.f32 %v2388_v36, %v2387_v33  ;;  %v2437_v42 = vadd.f32 %v2436_v38, %v2435_v34  ;;  %v523_v31 = vld [vmem:[#allocation2 + $0x58] sm:$0xff] }
 0x256   : > { %v539_v33 = vld [vmem:[#allocation2 + $0xd8] sm:$0xff] }
 0x257   : > { %1061 = vst [vmem:[#allocation2 + $0x20] sm:$0xff] %v1029_v39  ;;  %1077 = vst [vmem:[#allocation2 + $0xa0] sm:$0xff] %v1045_v40  ;;  %v1030_v43 = vadd.f32 %v2389_v41, %v517_v35  ;;  %v1046_v44 = vadd.f32 %v2437_v42, %v533_v37 }
 0x259   : > { %1062 = vst [vmem:[#allocation2 + $0x28] sm:$0xff] %v1030_v43  ;;  %1078 = vst [vmem:[#allocation2 + $0xa8] sm:$0xff] %v1046_v44  ;;  %v2390_v45 = vpop.f32.mrb[12].mxu0  ;;  %v2438_v46 = vpop.f32.mrb[12].mxu1  ;;  %v524_v43 = vld [vmem:[#allocation2 + $0x60] sm:$0xff] }
 0x25a   : > { %v2391_v48 = vpop.f32.mrb[13].mxu0  ;;  %v2439_v50 = vpop.f32.mrb[13].mxu1 }
 0x25b   : > { %v2392_v51 = vadd.f32 %v2391_v48, %v2390_v45  ;;  %v2440_v52 = vadd.f32 %v2439_v50, %v2438_v46  ;;  %v2393_v53 = vpop.f32.mrb[14].mxu0  ;;  %v2441_v54 = vpop.f32.mrb[14].mxu1  ;;  %v540_v45 = vld [vmem:[#allocation2 + $0xe0] sm:$0xff] }
 0x25c   : > { %v2394_v56 = vpop.f32.mrb[15].mxu0  ;;  %v2442_v58 = vpop.f32.mrb[15].mxu1 }
 0x25d   : > { %v1031_v59 = vadd.f32 %v2392_v51, %v518_v47  ;;  %v1047_v60 = vadd.f32 %v2440_v52, %v534_v49  ;;  %v2395_v61 = vadd.f32 %v2394_v56, %v2393_v53  ;;  %v2443_v62 = vadd.f32 %v2442_v58, %v2441_v54  ;;  %v525_v51 = vld [vmem:[#allocation2 + $0x68] sm:$0xff] }
 0x25e   : > { %v541_v53 = vld [vmem:[#allocation2 + $0xe8] sm:$0xff] }
 0x25f   : > { %1063 = vst [vmem:[#allocation2 + $0x30] sm:$0xff] %v1031_v59  ;;  %1079 = vst [vmem:[#allocation2 + $0xb0] sm:$0xff] %v1047_v60  ;;  %v1032_v63 = vadd.f32 %v2395_v61, %v519_v55  ;;  %v1048_v0 = vadd.f32 %v2443_v62, %v535_v57 }
 0x261   : > { %1064 = vst [vmem:[#allocation2 + $0x38] sm:$0xff] %v1032_v63  ;;  %1080 = vst [vmem:[#allocation2 + $0xb8] sm:$0xff] %v1048_v0  ;;  %v2396_v1 = vpop.f32.mrb[16].mxu0  ;;  %v2444_v2 = vpop.f32.mrb[16].mxu1  ;;  %v526_v63 = vld [vmem:[#allocation2 + $0x70] sm:$0xff] }
 0x262   : > { %v2397_v4 = vpop.f32.mrb[17].mxu0  ;;  %v2445_v6 = vpop.f32.mrb[17].mxu1 }
 0x263   : > { %v2398_v7 = vadd.f32 %v2397_v4, %v2396_v1  ;;  %v2446_v8 = vadd.f32 %v2445_v6, %v2444_v2  ;;  %v2399_v9 = vpop.f32.mrb[18].mxu0  ;;  %v2447_v10 = vpop.f32.mrb[18].mxu1  ;;  %v542_v1 = vld [vmem:[#allocation2 + $0xf0] sm:$0xff] }
 0x264   : > { %v2400_v12 = vpop.f32.mrb[19].mxu0  ;;  %v2448_v14 = vpop.f32.mrb[19].mxu1 }
 0x265   : > { %v1033_v15 = vadd.f32 %v2398_v7, %v520_v3  ;;  %v1049_v16 = vadd.f32 %v2446_v8, %v536_v5  ;;  %v2401_v17 = vadd.f32 %v2400_v12, %v2399_v9  ;;  %v2449_v18 = vadd.f32 %v2448_v14, %v2447_v10  ;;  %v527_v7 = vld [vmem:[#allocation2 + $0x78] sm:$0xff] }
 0x266   : > { %v543_v9 = vld [vmem:[#allocation2 + $0xf8] sm:$0xff] }
 0x267   : > { %1065 = vst [vmem:[#allocation2 + $0x40] sm:$0xff] %v1033_v15  ;;  %1081 = vst [vmem:[#allocation2 + $0xc0] sm:$0xff] %v1049_v16  ;;  %v1034_v19 = vadd.f32 %v2401_v17, %v521_v11  ;;  %v1050_v20 = vadd.f32 %v2449_v18, %v537_v13 }
 0x269   : > { %1066 = vst [vmem:[#allocation2 + $0x48] sm:$0xff] %v1034_v19  ;;  %1082 = vst [vmem:[#allocation2 + $0xc8] sm:$0xff] %v1050_v20  ;;  %v2402_v21 = vpop.f32.mrb[20].mxu0  ;;  %v2450_v22 = vpop.f32.mrb[20].mxu1 }
 0x26a   : > { %v2403_v24 = vpop.f32.mrb[21].mxu0  ;;  %v2451_v26 = vpop.f32.mrb[21].mxu1 }
 0x26b   : > { %v2404_v27 = vadd.f32 %v2403_v24, %v2402_v21  ;;  %v2452_v28 = vadd.f32 %v2451_v26, %v2450_v22  ;;  %v2405_v29 = vpop.f32.mrb[22].mxu0  ;;  %v2453_v30 = vpop.f32.mrb[22].mxu1 }
 0x26c   : > { %v2406_v32 = vpop.f32.mrb[23].mxu0  ;;  %v2454_v34 = vpop.f32.mrb[23].mxu1 }
 0x26d   : > { %v1035_v35 = vadd.f32 %v2404_v27, %v522_v23  ;;  %v1051_v36 = vadd.f32 %v2452_v28, %v538_v25  ;;  %v2407_v37 = vadd.f32 %v2406_v32, %v2405_v29  ;;  %v2455_v38 = vadd.f32 %v2454_v34, %v2453_v30 }
 0x26f   : > { %1067 = vst [vmem:[#allocation2 + $0x50] sm:$0xff] %v1035_v35  ;;  %1083 = vst [vmem:[#allocation2 + $0xd0] sm:$0xff] %v1051_v36  ;;  %v1036_v39 = vadd.f32 %v2407_v37, %v523_v31  ;;  %v1052_v40 = vadd.f32 %v2455_v38, %v539_v33 }
 0x271   : > { %1068 = vst [vmem:[#allocation2 + $0x58] sm:$0xff] %v1036_v39  ;;  %1084 = vst [vmem:[#allocation2 + $0xd8] sm:$0xff] %v1052_v40  ;;  %v2408_v41 = vpop.f32.mrb[24].mxu0  ;;  %v2456_v42 = vpop.f32.mrb[24].mxu1 }
 0x272   : > { %v2409_v44 = vpop.f32.mrb[25].mxu0  ;;  %v2457_v46 = vpop.f32.mrb[25].mxu1 }
 0x273   : > { %v2410_v47 = vadd.f32 %v2409_v44, %v2408_v41  ;;  %v2458_v48 = vadd.f32 %v2457_v46, %v2456_v42  ;;  %v2411_v49 = vpop.f32.mrb[26].mxu0  ;;  %v2459_v50 = vpop.f32.mrb[26].mxu1 }
 0x274   : > { %v2412_v52 = vpop.f32.mrb[27].mxu0  ;;  %v2460_v54 = vpop.f32.mrb[27].mxu1 }
 0x275   : > { %v1037_v55 = vadd.f32 %v2410_v47, %v524_v43  ;;  %v1053_v56 = vadd.f32 %v2458_v48, %v540_v45  ;;  %v2413_v57 = vadd.f32 %v2412_v52, %v2411_v49  ;;  %v2461_v58 = vadd.f32 %v2460_v54, %v2459_v50 }
 0x277   : > { %1069 = vst [vmem:[#allocation2 + $0x60] sm:$0xff] %v1037_v55  ;;  %1085 = vst [vmem:[#allocation2 + $0xe0] sm:$0xff] %v1053_v56  ;;  %v1038_v59 = vadd.f32 %v2413_v57, %v525_v51  ;;  %v1054_v60 = vadd.f32 %v2461_v58, %v541_v53 }
 0x279   : > { %1070 = vst [vmem:[#allocation2 + $0x68] sm:$0xff] %v1038_v59  ;;  %1086 = vst [vmem:[#allocation2 + $0xe8] sm:$0xff] %v1054_v60  ;;  %v2414_v61 = vpop.f32.mrb[28].mxu0  ;;  %v2462_v62 = vpop.f32.mrb[28].mxu1 }
 0x27a   : > { %v2415_v0 = vpop.f32.mrb[29].mxu0  ;;  %v2463_v2 = vpop.f32.mrb[29].mxu1 }
 0x27b   : > { %v2416_v3 = vadd.f32 %v2415_v0, %v2414_v61  ;;  %v2464_v4 = vadd.f32 %v2463_v2, %v2462_v62  ;;  %v2417_v5 = vpop.f32.mrb[30].mxu0  ;;  %v2465_v6 = vpop.f32.mrb[30].mxu1 }
 0x27c   : > { %v2418_v8 = vpop.f32.mrb[31].mxu0  ;;  %v2466_v10 = vpop.f32.mrb[31].mxu1 }
 0x27d   : > { %v1039_v11 = vadd.f32 %v2416_v3, %v526_v63  ;;  %v1055_v12 = vadd.f32 %v2464_v4, %v542_v1  ;;  %v2419_v13 = vadd.f32 %v2418_v8, %v2417_v5  ;;  %v2467_v14 = vadd.f32 %v2466_v10, %v2465_v6 }
 0x27f   : > { %1071 = vst [vmem:[#allocation2 + $0x70] sm:$0xff] %v1039_v11  ;;  %1087 = vst [vmem:[#allocation2 + $0xf0] sm:$0xff] %v1055_v12  ;;  %v1040_v15 = vadd.f32 %v2419_v13, %v527_v7  ;;  %v1056_v16 = vadd.f32 %v2467_v14, %v543_v9 }
 0x281   : > { %1072 = vst [vmem:[#allocation2 + $0x78] sm:$0xff] %v1040_v15  ;;  %1088 = vst [vmem:[#allocation2 + $0xf8] sm:$0xff] %v1056_v16 }
 0x282 PF: > { %s4165_s27 = sld [smem:[#allocation35_spill]] }
 0x288   : > { %p2249_p10 = scmp.ne.s32.totalorder %s4165_s27, 1 }
 0x289   : > { %v2872_v17 = vld [vmem:[#allocation13] sm:$0xff] (!%p2249_p10)   ;;  %v2874_v19 = vld [vmem:[#allocation13 + $0x8] sm:$0xff] (!%p2249_p10)   ;;  %v2876_v21 = vld [vmem:[#allocation13 + $0x10] sm:$0xff] (!%p2249_p10)   ;;  %s4166_s13 = sld [smem:[#allocation49_spill]] (!%p2249_p10)  ;;  %s4167_s11 = sld [smem:[#allocation51_spill]] (!%p2249_p10) }
 0x28a   : > { %1092 = sbr.rel (%p2249_p10) target bundleno = 963 (0x3c3), region = 80  ;;  %v2873_v18 = vld [vmem:[#allocation15] sm:$0xff] (!%p2249_p10)   ;;  %2516 = vmatprep.subr.bf16.mxu0 (!%p2249_p10), %v2872_v17  ;;  %v2875_v20 = vld [vmem:[#allocation15 + $0x8] sm:$0xff] (!%p2249_p10)   ;;  %v2877_v22 = vld [vmem:[#allocation15 + $0x10] sm:$0xff] (!%p2249_p10)  }
 0x28b   : > { %2517 = vmatpush3.bf16.msra.mxu0 (!%p2249_p10), %v2872_v17  ;;  %2564 = vmatprep.subr.bf16.mxu1 (!%p2249_p10), %v2873_v18  ;;  %v2878_v23 = vld [vmem:[#allocation13 + $0x18] sm:$0xff] (!%p2249_p10)   ;;  %v2880_v25 = vld [vmem:[#allocation13 + $0x20] sm:$0xff] (!%p2249_p10)   ;;  %v1094_v28 = vld [vmem:[#allocation2 + $0x8] sm:$0xff] (!%p2249_p10) }
 0x28c   : > { %2518 = vmatprep.subr.bf16.mxu0 (!%p2249_p10), %v2874_v19  ;;  %2565 = vmatpush3.bf16.msra.mxu1 (!%p2249_p10), %v2873_v18  ;;  %v2879_v24 = vld [vmem:[#allocation15 + $0x18] sm:$0xff] (!%p2249_p10)   ;;  %v2881_v26 = vld [vmem:[#allocation15 + $0x20] sm:$0xff] (!%p2249_p10)   ;;  %v2882_v30 = vld [vmem:[#allocation13 + $0x28] sm:$0xff] (!%p2249_p10)  }
 0x28d   : > { %2566 = vmatprep.subr.bf16.mxu1 (!%p2249_p10), %v2875_v20  ;;  %v1093_v27 = vld [vmem:[#allocation2] sm:$0xff] (!%p2249_p10)  ;;  %v2883_v33 = vld [vmem:[#allocation15 + $0x28] sm:$0xff] (!%p2249_p10)   ;;  %v2884_v39 = vld [vmem:[#allocation13 + $0x30] sm:$0xff] (!%p2249_p10)  }
 0x28e   : > { %v2278_v29 = vld [vmem:[%s3770_s1] sm:$0xff] (!%p2249_p10)   ;;  %v2341_v36 = vld [vmem:[%s3770_s1 + $0x8] sm:$0xff] (!%p2249_p10)   ;;  %v2342_v41 = vld [vmem:[%s3770_s1 + $0x10] sm:$0xff] (!%p2249_p10)  }
 0x28f   : > { %2519 = vmatpush3.bf16.msra.mxu0 (!%p2249_p10), %v2874_v19  ;;  %v2279_v31 = vunpack.c.l.bf16 (!%p2249_p10), %v2278_v29  ;;  %v2280_v32 = vunpack.c.h.bf16 (!%p2249_p10), %v2278_v29  ;;  %v2885_v42 = vld [vmem:[#allocation15 + $0x30] sm:$0xff] (!%p2249_p10)   ;;  %v2283_v44 = vunpack.c.l.bf16 (!%p2249_p10), %v2341_v36  ;;  %v2284_v45 = vunpack.c.h.bf16 (!%p2249_p10), %v2341_v36  ;;  %v1096_v47 = vld [vmem:[#allocation2 + $0x18] sm:$0xff] (!%p2249_p10)  ;;  %v1097_v51 = vld [vmem:[#allocation2 + $0x20] sm:$0xff] (!%p2249_p10) }
 0x290   : > { %2520 = vmatprep.subr.bf16.mxu0 (!%p2249_p10), %v2876_v21  ;;  %2567 = vmatpush3.bf16.msra.mxu1 (!%p2249_p10), %v2875_v20  ;;  %v1095_v46 = vld [vmem:[#allocation2 + $0x10] sm:$0xff] (!%p2249_p10)  ;;  %v2287_v48 = vunpack.c.l.bf16 (!%p2249_p10), %v2342_v41  ;;  %v2288_v49 = vunpack.c.h.bf16 (!%p2249_p10), %v2342_v41  ;;  %v2886_v50 = vld [vmem:[#allocation13 + $0x38] sm:$0xff] (!%p2249_p10)   ;;  %v1098_v52 = vld [vmem:[#allocation2 + $0x28] sm:$0xff] (!%p2249_p10) }
 0x291   : > { %2568 = vmatprep.subr.bf16.mxu1 %v2877_v22  ;;  %v1189_v34 = vadd.f32 %v2279_v31, %v1093_v27  ;;  %v1190_v35 = vadd.f32 %v2280_v32, %v1094_v28  ;;  %v1565_v37 = vmul.f32 %v2279_v31, %v1093_v27  ;;  %v1566_v38 = vmul.f32 %v2280_v32, %v1094_v28  ;;  %v2887_v53 = vld [vmem:[#allocation15 + $0x38] sm:$0xff]   ;;  %v2344_v63 = vld [vmem:[%s3770_s1 + $0x20] sm:$0xff]   ;;  %v1099_v5 = vld [vmem:[#allocation2 + $0x30] sm:$0xff] }
 0x292   : > { %v1191_v54 = vadd.f32 %v2283_v44, %v1095_v46  ;;  %v1192_v55 = vadd.f32 %v2284_v45, %v1096_v47  ;;  %v1567_v56 = vmul.f32 %v2283_v44, %v1095_v46  ;;  %v1568_v57 = vmul.f32 %v2284_v45, %v1096_v47  ;;  %v2343_v60 = vld [vmem:[%s3770_s1 + $0x18] sm:$0xff]   ;;  %v1101_v10 = vld [vmem:[#allocation2 + $0x40] sm:$0xff]  ;;  %v1102_v11 = vld [vmem:[#allocation2 + $0x48] sm:$0xff] }
 0x293   : > { %2521 = vmatpush3.bf16.msra.mxu0 %v2876_v21  ;;  %v1221_v40 = vpack.c.bf16 %v1190_v35, %v1189_v34  ;;  %v1597_v43 = vpack.c.bf16 %v1566_v38, %v1565_v37  ;;  %v1193_v58 = vadd.f32 %v2287_v48, %v1097_v51  ;;  %v1194_v59 = vadd.f32 %v2288_v49, %v1098_v52  ;;  %v1100_v6 = vld [vmem:[#allocation2 + $0x38] sm:$0xff]  ;;  %v2345_v18 = vld [vmem:[%s3770_s1 + $0x28] sm:$0xff]   ;;  %v2346_v21 = vld [vmem:[%s3770_s1 + $0x30] sm:$0xff]  }
 0x294   : > { %2522 = vmatprep.subr.bf16.mxu0 %v2878_v23  ;;  %2569 = vmatpush3.bf16.msra.mxu1 %v2877_v22  ;;  %v1569_v61 = vmul.f32 %v2287_v48, %v1097_v51  ;;  %v1570_v62 = vmul.f32 %v2288_v49, %v1098_v52  ;;  %v1222_v0 = vpack.c.bf16 %v1192_v55, %v1191_v54  ;;  %v2291_v1 = vunpack.c.l.bf16 %v2343_v60  ;;  %v1103_v27 = vld [vmem:[#allocation2 + $0x50] sm:$0xff]  ;;  %v1104_v28 = vld [vmem:[#allocation2 + $0x58] sm:$0xff]  ;;  %v1105_v32 = vld [vmem:[#allocation2 + $0x60] sm:$0xff] }
 0x295   : > { %2570 = vmatprep.subr.bf16.mxu1 %v2879_v24  ;;  %2532 = vmatprep.mubr.bf16.mxu0 %v1221_v40  ;;  %v2292_v2 = vunpack.c.h.bf16 %v2343_v60  ;;  %v1598_v3 = vpack.c.bf16 %v1568_v57, %v1567_v56  ;;  %v1223_v4 = vpack.c.bf16 %v1194_v59, %v1193_v58  ;;  %v2295_v7 = vunpack.c.l.bf16 %v2344_v63  ;;  %v2347_v40 = vld [vmem:[%s3770_s1 + $0x38] sm:$0xff]   ;;  %v1107_v49 = vld [vmem:[#allocation2 + $0x70] sm:$0xff]  ;;  %v1109_v54 = vld [vmem:[#allocation2 + $0x80] sm:$0xff] }
 0x296   : > { %2580 = vmatprep.mubr.bf16.mxu1 %v1597_v43  ;;  %v2296_v8 = vunpack.c.h.bf16 %v2344_v63  ;;  %v1599_v9 = vpack.c.bf16 %v1570_v62, %v1569_v61  ;;  %v1195_v12 = vadd.f32 %v2291_v1, %v1099_v5  ;;  %v1571_v14 = vmul.f32 %v2291_v1, %v1099_v5  ;;  %v2348_v43 = vld [vmem:[%s3770_s1 + $0x40] sm:$0xff]   ;;  %v1110_v55 = vld [vmem:[#allocation2 + $0x88] sm:$0xff]  ;;  %v2350_v1 = vld [vmem:[%s3770_s1 + $0x50] sm:$0xff]  }
 0x297   : > { %2523 = vmatpush3.bf16.msra.mxu0 %v2878_v23  ;;  %v1196_v13 = vadd.f32 %v2292_v2, %v1100_v6  ;;  %v1572_v15 = vmul.f32 %v2292_v2, %v1100_v6  ;;  %v1197_v16 = vadd.f32 %v2295_v7, %v1101_v10  ;;  %v1573_v19 = vmul.f32 %v2295_v7, %v1101_v10  ;;  %v2349_v62 = vld [vmem:[%s3770_s1 + $0x48] sm:$0xff]   ;;  %v1111_v7 = vld [vmem:[#allocation2 + $0x90] sm:$0xff] }
 0x298   : > { %2524 = vmatprep.subr.bf16.mxu0 %v2880_v25  ;;  %2571 = vmatpush3.bf16.msra.mxu1 %v2879_v24  ;;  %v1198_v17 = vadd.f32 %v2296_v8, %v1102_v11  ;;  %v1574_v20 = vmul.f32 %v2296_v8, %v1102_v11  ;;  %v2299_v23 = vunpack.c.l.bf16 %v2345_v18  ;;  %v2300_v24 = vunpack.c.h.bf16 %v2345_v18  ;;  %v1112_v8 = vld [vmem:[#allocation2 + $0x98] sm:$0xff] }
 0x299   : > { %2572 = vmatprep.subr.bf16.mxu1 %v2881_v26  ;;  %v1224_v22 = vpack.c.bf16 %v1196_v13, %v1195_v12  ;;  %v2303_v29 = vunpack.c.l.bf16 %v2346_v21  ;;  %v2307_v45 = vunpack.c.l.bf16 %v2347_v40  ;;  %v2308_v46 = vunpack.c.h.bf16 %v2347_v40  ;;  %v1113_v12 = vld [vmem:[#allocation2 + $0xa0] sm:$0xff]  ;;  %v1114_v13 = vld [vmem:[#allocation2 + $0xa8] sm:$0xff] }
 0x29a   : > { %v1601_v31 = vpack.c.bf16 %v1574_v20, %v1573_v19  ;;  %v1199_v34 = vadd.f32 %v2299_v23, %v1103_v27  ;;  %v1200_v35 = vadd.f32 %v2300_v24, %v1104_v28  ;;  %v1575_v36 = vmul.f32 %v2299_v23, %v1103_v27  ;;  %v2351_v20 = vld [vmem:[%s3770_s1 + $0x58] sm:$0xff]   ;;  %v2352_v23 = vld [vmem:[%s3770_s1 + $0x60] sm:$0xff]  }
 0x29b   : > { %2525 = vmatpush3.bf16.msra.mxu0 %v2880_v25  ;;  %v1600_v25 = vpack.c.bf16 %v1572_v15, %v1571_v14  ;;  %v1576_v37 = vmul.f32 %v2300_v24, %v1104_v28  ;;  %v1201_v38 = vadd.f32 %v2303_v29, %v1105_v32  ;;  %v1577_v41 = vmul.f32 %v2303_v29, %v1105_v32  ;;  %v1115_v29 = vld [vmem:[#allocation2 + $0xb0] sm:$0xff] }
 0x29c   : > { %2526 = vmatprep.subr.bf16.mxu0 %v2882_v30  ;;  %2573 = vmatpush3.bf16.msra.mxu1 %v2881_v26  ;;  %v1225_v26 = vpack.c.bf16 %v1198_v17, %v1197_v16  ;;  %v1226_v44 = vpack.c.bf16 %v1200_v35, %v1199_v34  ;;  %v2311_v51 = vunpack.c.l.bf16 %v2348_v43  ;;  %v2312_v52 = vunpack.c.h.bf16 %v2348_v43  ;;  %v1117_v34 = vld [vmem:[#allocation2 + $0xc0] sm:$0xff]  ;;  %v1118_v35 = vld [vmem:[#allocation2 + $0xc8] sm:$0xff] }
 0x29d   : > { %2574 = vmatprep.subr.bf16.mxu1 %v2883_v33  ;;  %v1602_v47 = vpack.c.bf16 %v1576_v37, %v1575_v36  ;;  %v1203_v56 = vadd.f32 %v2307_v45, %v1107_v49  ;;  %v1579_v58 = vmul.f32 %v2307_v45, %v1107_v49  ;;  %v2320_v10 = vunpack.c.h.bf16 %v2350_v1  ;;  %v2354_v45 = vld [vmem:[%s3770_s1 + $0x70] sm:$0xff]  }
 0x29e   : > { %v1205_v60 = vadd.f32 %v2311_v51, %v1109_v54  ;;  %v1206_v61 = vadd.f32 %v2312_v52, %v1110_v55  ;;  %v1581_v63 = vmul.f32 %v2311_v51, %v1109_v54  ;;  %v2328_v32 = vunpack.c.h.bf16 %v2352_v23  ;;  %v1119_v51 = vld [vmem:[#allocation2 + $0xd0] sm:$0xff] }
 0x29f   : > { %2527 = vmatpush3.bf16.msra.mxu0 %v2882_v30  ;;  %v2304_v30 = vunpack.c.h.bf16 %v2346_v21  ;;  %v1210_v19 = vadd.f32 %v2320_v10, %v1114_v13  ;;  %v2336_v54 = vunpack.c.h.bf16 %v2354_v45 }
 0x2a0   : > { %2528 = vmatprep.subr.bf16.mxu0 %v2884_v39  ;;  %2575 = vmatpush3.bf16.msra.mxu1 %v2883_v33  ;;  %v1106_v33 = vld [vmem:[#allocation2 + $0x68] sm:$0xff]  ;;  %v1229_v6 = vpack.c.bf16 %v1206_v61, %v1205_v60 }
 0x2a1   : > { %2576 = vmatprep.subr.bf16.mxu1 %v2885_v42 }
 0x2a3   : > { %2529 = vmatpush3.bf16.msra.mxu0 %v2884_v39  ;;  %v1202_v39 = vadd.f32 %v2304_v30, %v1106_v33 }
 0x2a4   : > { %2530 = vmatprep.subr.bf16.mxu0 %v2886_v50  ;;  %2577 = vmatpush3.bf16.msra.mxu1 %v2885_v42  ;;  %v1578_v42 = vmul.f32 %v2304_v30, %v1106_v33  ;;  %v1116_v30 = vld [vmem:[#allocation2 + $0xb8] sm:$0xff] }
 0x2a5   : > { %2578 = vmatprep.subr.bf16.mxu1 %v2887_v53  ;;  %v1227_v48 = vpack.c.bf16 %v1202_v39, %v1201_v38 }
 0x2a7   : > { %2531 = vmatpush3.bf16.msra.mxu0 %v2886_v50  ;;  %v1108_v50 = vld [vmem:[#allocation2 + $0x78] sm:$0xff] }
 0x2a8   : > { %2579 = vmatpush3.bf16.msra.mxu1 %v2887_v53  ;;  %v1603_v53 = vpack.c.bf16 %v1578_v42, %v1577_v41  ;;  %v1204_v57 = vadd.f32 %v2308_v46, %v1108_v50  ;;  %v1580_v59 = vmul.f32 %v2308_v46, %v1108_v50  ;;  %v1214_v41 = vadd.f32 %v2328_v32, %v1118_v35  ;;  %v2353_v42 = vld [vmem:[%s3770_s1 + $0x68] sm:$0xff]  }
 0x2aa   : > { %2533 = vmatmul.mubr.bf16.vlgmr.msra.gmra.mrb[0].mxu0 %v1222_v0  ;;  %v1582_v0 = vmul.f32 %v2312_v52, %v1110_v55  ;;  %v1228_v2 = vpack.c.bf16 %v1204_v57, %v1203_v56  ;;  %v1604_v5 = vpack.c.bf16 %v1580_v59, %v1579_v58  ;;  %v1120_v52 = vld [vmem:[#allocation2 + $0xd8] sm:$0xff]  ;;  %v1121_v56 = vld [vmem:[#allocation2 + $0xe0] sm:$0xff]  ;;  %v1122_v57 = vld [vmem:[#allocation2 + $0xe8] sm:$0xff] }
 0x2ab   : > { %2581 = vmatmul.mubr.bf16.vlgmr.msra.gmra.mrb[0].mxu1 %v1598_v3  ;;  %2536 = vmatprep.mubr.bf16.mxu0 %v1223_v4  ;;  %v2315_v3 = vunpack.c.l.bf16 %v2349_v62  ;;  %v2316_v4 = vunpack.c.h.bf16 %v2349_v62 }
 0x2ac   : > { %2584 = vmatprep.mubr.bf16.mxu1 %v1599_v9  ;;  %v2319_v9 = vunpack.c.l.bf16 %v2350_v1  ;;  %v1605_v11 = vpack.c.bf16 %v1582_v0, %v1581_v63  ;;  %v1218_v63 = vadd.f32 %v2336_v54, %v1122_v57  ;;  %v2355_v0 = vld [vmem:[%s3770_s1 + $0x78] sm:$0xff]  }
 0x2ad   : > { %v1207_v14 = vadd.f32 %v2315_v3, %v1111_v7  ;;  %v1208_v15 = vadd.f32 %v2316_v4, %v1112_v8  ;;  %v1583_v16 = vmul.f32 %v2315_v3, %v1111_v7  ;;  %v1584_v17 = vmul.f32 %v2316_v4, %v1112_v8  ;;  %v1123_v8 = vld [vmem:[#allocation2 + $0xf0] sm:$0xff] }
 0x2ae   : > { %v1209_v18 = vadd.f32 %v2319_v9, %v1113_v12  ;;  %v1585_v21 = vmul.f32 %v2319_v9, %v1113_v12  ;;  %v2339_v4 = vunpack.c.l.bf16 %v2355_v0  ;;  %v1124_v9 = vld [vmem:[#allocation2 + $0xf8] sm:$0xff] }
 0x2af   : > { %v1230_v24 = vpack.c.bf16 %v1208_v15, %v1207_v14  ;;  %v1606_v27 = vpack.c.bf16 %v1584_v17, %v1583_v16  ;;  %v3854_v17 = vld [vmem:[%s4166_s13] ss:$0 sm:$0xff] }
 0x2b0   : > { %v1231_v28 = vpack.c.bf16 %v1210_v19, %v1209_v18  ;;  %v3859_v18 = vld [vmem:[%s4167_s11] ss:$0 sm:$0xff] }
 0x2b2   : > { %2537 = vmatmul.mubr.bf16.gmra.mrb[4].mxu0 %v1224_v22  ;;  %v1586_v22 = vmul.f32 %v2320_v10, %v1114_v13  ;;  %v1595_v13 = vmul.f32 %v2339_v4, %v1123_v8 }
 0x2b3   : > { %2585 = vmatmul.mubr.bf16.gmra.mrb[4].mxu1 %v1600_v25  ;;  %2540 = vmatprep.mubr.bf16.mxu0 %v1225_v26  ;;  %v2323_v25 = vunpack.c.l.bf16 %v2351_v20  ;;  %v2324_v26 = vunpack.c.h.bf16 %v2351_v20 }
 0x2b4   : > { %2588 = vmatprep.mubr.bf16.mxu1 %v1601_v31  ;;  %v2327_v31 = vunpack.c.l.bf16 %v2352_v23  ;;  %v1607_v33 = vpack.c.bf16 %v1586_v22, %v1585_v21 }
 0x2b5   : > { %v1211_v36 = vadd.f32 %v2323_v25, %v1115_v29  ;;  %v1212_v37 = vadd.f32 %v2324_v26, %v1116_v30  ;;  %v1587_v38 = vmul.f32 %v2323_v25, %v1115_v29  ;;  %v1588_v39 = vmul.f32 %v2324_v26, %v1116_v30 }
 0x2b6   : > { %v1213_v40 = vadd.f32 %v2327_v31, %v1117_v34  ;;  %v1589_v43 = vmul.f32 %v2327_v31, %v1117_v34 }
 0x2b7   : > { %v1232_v46 = vpack.c.bf16 %v1212_v37, %v1211_v36  ;;  %v1608_v49 = vpack.c.bf16 %v1588_v39, %v1587_v38 }
 0x2b8   : > { %v1233_v50 = vpack.c.bf16 %v1214_v41, %v1213_v40 }
 0x2ba   : > { %2541 = vmatmul.mubr.bf16.gmra.mrb[8].mxu0 %v1226_v44  ;;  %v1590_v44 = vmul.f32 %v2328_v32, %v1118_v35 }
 0x2bb   : > { %2589 = vmatmul.mubr.bf16.gmra.mrb[8].mxu1 %v1602_v47  ;;  %2544 = vmatprep.mubr.bf16.mxu0 %v1227_v48  ;;  %v2331_v47 = vunpack.c.l.bf16 %v2353_v42  ;;  %v2332_v48 = vunpack.c.h.bf16 %v2353_v42 }
 0x2bc   : > { %2592 = vmatprep.mubr.bf16.mxu1 %v1603_v53  ;;  %v2335_v53 = vunpack.c.l.bf16 %v2354_v45  ;;  %v1609_v55 = vpack.c.bf16 %v1590_v44, %v1589_v43 }
 0x2bd   : > { %v1215_v58 = vadd.f32 %v2331_v47, %v1119_v51  ;;  %v1216_v59 = vadd.f32 %v2332_v48, %v1120_v52  ;;  %v1591_v60 = vmul.f32 %v2331_v47, %v1119_v51  ;;  %v1592_v61 = vmul.f32 %v2332_v48, %v1120_v52 }
 0x2be   : > { %v1217_v62 = vadd.f32 %v2335_v53, %v1121_v56  ;;  %v1593_v1 = vmul.f32 %v2335_v53, %v1121_v56 }
 0x2bf   : > { %v1234_v3 = vpack.c.bf16 %v1216_v59, %v1215_v58 }
 0x2c0   : > { %v1235_v7 = vpack.c.bf16 %v1218_v63, %v1217_v62 }
 0x2c2   : > { %2545 = vmatmul.mubr.bf16.gmra.mrb[12].mxu0 %v1228_v2  ;;  %v1594_v2 = vmul.f32 %v2336_v54, %v1122_v57 }
 0x2c3   : > { %2593 = vmatmul.mubr.bf16.gmra.mrb[12].mxu1 %v1604_v5  ;;  %2548 = vmatprep.mubr.bf16.mxu0 %v1229_v6  ;;  %v2340_v5 = vunpack.c.h.bf16 %v2355_v0  ;;  %v1610_v6 = vpack.c.bf16 %v1592_v61, %v1591_v60 }
 0x2c4   : > { %2596 = vmatprep.mubr.bf16.mxu1 %v1605_v11  ;;  %v1611_v10 = vpack.c.bf16 %v1594_v2, %v1593_v1  ;;  %v1219_v11 = vadd.f32 %v2339_v4, %v1123_v8 }
 0x2c5   : > { %v1220_v12 = vadd.f32 %v2340_v5, %v1124_v9  ;;  %v1596_v14 = vmul.f32 %v2340_v5, %v1124_v9 }
 0x2c7   : > { %v1236_v15 = vpack.c.bf16 %v1220_v12, %v1219_v11  ;;  %v1612_v16 = vpack.c.bf16 %v1596_v14, %v1595_v13 }
 0x2ca   : > { %2549 = vmatmul.mubr.bf16.gmra.mrb[16].mxu0 %v1230_v24 }
 0x2cb   : > { %2597 = vmatmul.mubr.bf16.gmra.mrb[16].mxu1 %v1606_v27  ;;  %2552 = vmatprep.mubr.bf16.mxu0 %v1231_v28 }
 0x2cc   : > { %2600 = vmatprep.mubr.bf16.mxu1 %v1607_v33 }
 0x2d2   : > { %2553 = vmatmul.mubr.bf16.gmra.mrb[20].mxu0 %v1232_v46 }
 0x2d3   : > { %2601 = vmatmul.mubr.bf16.gmra.mrb[20].mxu1 %v1608_v49  ;;  %2556 = vmatprep.mubr.bf16.mxu0 %v1233_v50 }
 0x2d4   : > { %2604 = vmatprep.mubr.bf16.mxu1 %v1609_v55 }
 0x2da   : > { %2557 = vmatmul.mubr.bf16.gmra.mrb[24].mxu0 %v1234_v3 }
 0x2db   : > { %2605 = vmatmul.mubr.bf16.gmra.mrb[24].mxu1 %v1610_v6  ;;  %2560 = vmatprep.mubr.bf16.mxu0 %v1235_v7 }
 0x2dc   : > { %2608 = vmatprep.mubr.bf16.mxu1 %v1611_v10 }
 0x2e2   : > { %2561 = vmatmul.mubr.bf16.gmra.mrb[28].mxu0 %v1236_v15 }
 0x2e3   : > { %2609 = vmatmul.mubr.bf16.gmra.mrb[28].mxu1 %v1612_v16 }
 0x37d   : > { %v2534_v19 = vpop.f32.mrb[0].mxu0 }
 0x37e   : > { %v1351_v20 = vadd.f32 %v2534_v19, %v3854_v17  ;;  %v1342_v21 = vpop.f32.mrb[1].mxu0  ;;  %v2582_v22 = vpop.f32.mrb[0].mxu1 }
 0x37f   : > { %v1343_v23 = vadd.f32 %v3854_v17, %v1342_v21  ;;  %v2535_v24 = vpop.f32.mrb[2].mxu0  ;;  %v1727_v25 = vadd.f32 %v2582_v22, %v3859_v18  ;;  %v1718_v26 = vpop.f32.mrb[1].mxu1 }
 0x380   : > { %v1471_v27 = vmul.f32 0.01, %v1351_v20  ;;  %v1354_v28 = vadd.f32 %v2535_v24, %v3854_v17  ;;  %v1345_v29 = vpop.f32.mrb[3].mxu0  ;;  %v1719_v30 = vadd.f32 %v3859_v18, %v1718_v26  ;;  %v2583_v31 = vpop.f32.mrb[2].mxu1 }
 0x381   : > { %v1469_v32 = vmul.f32 0.01, %v1343_v23  ;;  %v1346_v33 = vadd.f32 %v3854_v17, %v1345_v29  ;;  %v1879_v34 = vmul.f32 0.01, %v1727_v25  ;;  %v1730_v35 = vadd.f32 %v2583_v31, %v3859_v18  ;;  %v1721_v36 = vpop.f32.mrb[3].mxu1 }
 0x382   : > { %v1503_v37 = vmax.f32 %v1351_v20, %v1471_v27  ;;  %v1472_v38 = vmul.f32 0.01, %v1354_v28  ;;  %v1877_v39 = vmul.f32 0.01, %v1719_v30  ;;  %v1722_v40 = vadd.f32 %v3859_v18, %v1721_v36 }
 0x383   : > { %v1501_v41 = vmax.f32 %v1343_v23, %v1469_v32  ;;  %v1470_v42 = vmul.f32 0.01, %v1346_v33  ;;  %v1911_v43 = vmax.f32 %v1727_v25, %v1879_v34  ;;  %v1880_v44 = vmul.f32 0.01, %v1730_v35 }
 0x384   : > { %v1504_v45 = vmax.f32 %v1354_v28, %v1472_v38  ;;  %v1909_v46 = vmax.f32 %v1719_v30, %v1877_v39  ;;  %v1878_v47 = vmul.f32 0.01, %v1722_v40 }
 0x385   : > { %v1502_v48 = vmax.f32 %v1346_v33, %v1470_v42  ;;  %v1943_v49 = vadd.f32 %v1911_v43, %v1503_v37  ;;  %v1912_v50 = vmax.f32 %v1730_v35, %v1880_v44  ;;  %v2538_v51 = vpop.f32.mrb[4].mxu0 }
 0x386   : > { %v1941_v52 = vadd.f32 %v1909_v46, %v1501_v41  ;;  %v1910_v53 = vmax.f32 %v1722_v40, %v1878_v47  ;;  %v1367_v54 = vadd.f32 %v2538_v51, %v3854_v17  ;;  %v1358_v55 = vpop.f32.mrb[5].mxu0  ;;  %v2586_v56 = vpop.f32.mrb[4].mxu1 }
 0x387   : > { %1975 = vst [vmem:[%s3781_s26 + $0x10] sm:$0xff] %v1943_v49  ;;  %v1944_v57 = vadd.f32 %v1912_v50, %v1504_v45  ;;  %v1359_v58 = vadd.f32 %v3854_v17, %v1358_v55  ;;  %v2539_v59 = vpop.f32.mrb[6].mxu0  ;;  %v1743_v60 = vadd.f32 %v2586_v56, %v3859_v18  ;;  %v1734_v61 = vpop.f32.mrb[5].mxu1 }
 0x388   : > { %1973 = vst [vmem:[%s3781_s26] sm:$0xff] %v1941_v52  ;;  %v1942_v62 = vadd.f32 %v1910_v53, %v1502_v48  ;;  %v1475_v63 = vmul.f32 0.01, %v1367_v54  ;;  %v1370_v0 = vadd.f32 %v2539_v59, %v3854_v17  ;;  %v1361_v1 = vpop.f32.mrb[7].mxu0  ;;  %v1735_v2 = vadd.f32 %v3859_v18, %v1734_v61  ;;  %v2587_v3 = vpop.f32.mrb[6].mxu1 }
 0x389   : > { %1976 = vst [vmem:[%s3781_s26 + $0x18] sm:$0xff] %v1944_v57  ;;  %v1473_v4 = vmul.f32 0.01, %v1359_v58  ;;  %v1362_v5 = vadd.f32 %v3854_v17, %v1361_v1  ;;  %v1883_v6 = vmul.f32 0.01, %v1743_v60  ;;  %v1746_v7 = vadd.f32 %v2587_v3, %v3859_v18  ;;  %v1737_v8 = vpop.f32.mrb[7].mxu1 }
 0x38a   : > { %1974 = vst [vmem:[%s3781_s26 + $0x8] sm:$0xff] %v1942_v62  ;;  %v1507_v9 = vmax.f32 %v1367_v54, %v1475_v63  ;;  %v1476_v10 = vmul.f32 0.01, %v1370_v0  ;;  %v1881_v11 = vmul.f32 0.01, %v1735_v2  ;;  %v1738_v12 = vadd.f32 %v3859_v18, %v1737_v8 }
 0x38b   : > { %v1505_v13 = vmax.f32 %v1359_v58, %v1473_v4  ;;  %v1474_v14 = vmul.f32 0.01, %v1362_v5  ;;  %v1915_v15 = vmax.f32 %v1743_v60, %v1883_v6  ;;  %v1884_v16 = vmul.f32 0.01, %v1746_v7 }
 0x38c   : > { %v1508_v19 = vmax.f32 %v1370_v0, %v1476_v10  ;;  %v1913_v20 = vmax.f32 %v1735_v2, %v1881_v11  ;;  %v1882_v21 = vmul.f32 0.01, %v1738_v12 }
 0x38d   : > { %v1506_v22 = vmax.f32 %v1362_v5, %v1474_v14  ;;  %v1947_v23 = vadd.f32 %v1915_v15, %v1507_v9  ;;  %v1916_v24 = vmax.f32 %v1746_v7, %v1884_v16  ;;  %v2542_v25 = vpop.f32.mrb[8].mxu0 }
 0x38e   : > { %v1945_v26 = vadd.f32 %v1913_v20, %v1505_v13  ;;  %v1914_v27 = vmax.f32 %v1738_v12, %v1882_v21  ;;  %v1383_v28 = vadd.f32 %v2542_v25, %v3854_v17  ;;  %v1374_v29 = vpop.f32.mrb[9].mxu0  ;;  %v2590_v30 = vpop.f32.mrb[8].mxu1 }
 0x38f   : > { %1979 = vst [vmem:[%s3781_s26 + $0x30] sm:$0xff] %v1947_v23  ;;  %v1948_v31 = vadd.f32 %v1916_v24, %v1508_v19  ;;  %v1375_v32 = vadd.f32 %v3854_v17, %v1374_v29  ;;  %v2543_v33 = vpop.f32.mrb[10].mxu0  ;;  %v1759_v34 = vadd.f32 %v2590_v30, %v3859_v18  ;;  %v1750_v35 = vpop.f32.mrb[9].mxu1 }
 0x390   : > { %1977 = vst [vmem:[%s3781_s26 + $0x20] sm:$0xff] %v1945_v26  ;;  %v1946_v36 = vadd.f32 %v1914_v27, %v1506_v22  ;;  %v1479_v37 = vmul.f32 0.01, %v1383_v28  ;;  %v1386_v38 = vadd.f32 %v2543_v33, %v3854_v17  ;;  %v1377_v39 = vpop.f32.mrb[11].mxu0  ;;  %v1751_v40 = vadd.f32 %v3859_v18, %v1750_v35  ;;  %v2591_v41 = vpop.f32.mrb[10].mxu1 }
 0x391   : > { %1980 = vst [vmem:[%s3781_s26 + $0x38] sm:$0xff] %v1948_v31  ;;  %v1477_v42 = vmul.f32 0.01, %v1375_v32  ;;  %v1378_v43 = vadd.f32 %v3854_v17, %v1377_v39  ;;  %v1887_v44 = vmul.f32 0.01, %v1759_v34  ;;  %v1762_v45 = vadd.f32 %v2591_v41, %v3859_v18  ;;  %v1753_v46 = vpop.f32.mrb[11].mxu1 }
 0x392   : > { %1978 = vst [vmem:[%s3781_s26 + $0x28] sm:$0xff] %v1946_v36  ;;  %v1511_v47 = vmax.f32 %v1383_v28, %v1479_v37  ;;  %v1480_v48 = vmul.f32 0.01, %v1386_v38  ;;  %v1885_v49 = vmul.f32 0.01, %v1751_v40  ;;  %v1754_v50 = vadd.f32 %v3859_v18, %v1753_v46 }
 0x393   : > { %v1509_v51 = vmax.f32 %v1375_v32, %v1477_v42  ;;  %v1478_v52 = vmul.f32 0.01, %v1378_v43  ;;  %v1919_v53 = vmax.f32 %v1759_v34, %v1887_v44  ;;  %v1888_v54 = vmul.f32 0.01, %v1762_v45 }
 0x394   : > { %v1512_v55 = vmax.f32 %v1386_v38, %v1480_v48  ;;  %v1917_v56 = vmax.f32 %v1751_v40, %v1885_v49  ;;  %v1886_v57 = vmul.f32 0.01, %v1754_v50 }
 0x395   : > { %v1510_v58 = vmax.f32 %v1378_v43, %v1478_v52  ;;  %v1951_v59 = vadd.f32 %v1919_v53, %v1511_v47  ;;  %v1920_v60 = vmax.f32 %v1762_v45, %v1888_v54  ;;  %v2546_v61 = vpop.f32.mrb[12].mxu0 }
 0x396   : > { %v1949_v62 = vadd.f32 %v1917_v56, %v1509_v51  ;;  %v1918_v63 = vmax.f32 %v1754_v50, %v1886_v57  ;;  %v1399_v0 = vadd.f32 %v2546_v61, %v3854_v17  ;;  %v1390_v1 = vpop.f32.mrb[13].mxu0  ;;  %v2594_v2 = vpop.f32.mrb[12].mxu1 }
 0x397   : > { %1983 = vst [vmem:[%s3781_s26 + $0x50] sm:$0xff] %v1951_v59  ;;  %v1952_v3 = vadd.f32 %v1920_v60, %v1512_v55  ;;  %v1391_v4 = vadd.f32 %v3854_v17, %v1390_v1  ;;  %v2547_v5 = vpop.f32.mrb[14].mxu0  ;;  %v1775_v6 = vadd.f32 %v2594_v2, %v3859_v18  ;;  %v1766_v7 = vpop.f32.mrb[13].mxu1 }
 0x398   : > { %1981 = vst [vmem:[%s3781_s26 + $0x40] sm:$0xff] %v1949_v62  ;;  %v1950_v8 = vadd.f32 %v1918_v63, %v1510_v58  ;;  %v1483_v9 = vmul.f32 0.01, %v1399_v0  ;;  %v1402_v10 = vadd.f32 %v2547_v5, %v3854_v17  ;;  %v1393_v11 = vpop.f32.mrb[15].mxu0  ;;  %v1767_v12 = vadd.f32 %v3859_v18, %v1766_v7  ;;  %v2595_v13 = vpop.f32.mrb[14].mxu1 }
 0x399   : > { %1984 = vst [vmem:[%s3781_s26 + $0x58] sm:$0xff] %v1952_v3  ;;  %v1481_v14 = vmul.f32 0.01, %v1391_v4  ;;  %v1394_v15 = vadd.f32 %v3854_v17, %v1393_v11  ;;  %v1891_v16 = vmul.f32 0.01, %v1775_v6  ;;  %v1778_v19 = vadd.f32 %v2595_v13, %v3859_v18  ;;  %v1769_v20 = vpop.f32.mrb[15].mxu1 }
 0x39a   : > { %1982 = vst [vmem:[%s3781_s26 + $0x48] sm:$0xff] %v1950_v8  ;;  %v1515_v21 = vmax.f32 %v1399_v0, %v1483_v9  ;;  %v1484_v22 = vmul.f32 0.01, %v1402_v10  ;;  %v1889_v23 = vmul.f32 0.01, %v1767_v12  ;;  %v1770_v24 = vadd.f32 %v3859_v18, %v1769_v20 }
 0x39b   : > { %v1513_v25 = vmax.f32 %v1391_v4, %v1481_v14  ;;  %v1482_v26 = vmul.f32 0.01, %v1394_v15  ;;  %v1923_v27 = vmax.f32 %v1775_v6, %v1891_v16  ;;  %v1892_v28 = vmul.f32 0.01, %v1778_v19 }
 0x39c   : > { %v1516_v29 = vmax.f32 %v1402_v10, %v1484_v22  ;;  %v1921_v30 = vmax.f32 %v1767_v12, %v1889_v23  ;;  %v1890_v31 = vmul.f32 0.01, %v1770_v24 }
 0x39d   : > { %v1514_v32 = vmax.f32 %v1394_v15, %v1482_v26  ;;  %v1955_v33 = vadd.f32 %v1923_v27, %v1515_v21  ;;  %v1924_v34 = vmax.f32 %v1778_v19, %v1892_v28  ;;  %v2550_v35 = vpop.f32.mrb[16].mxu0 }
 0x39e   : > { %v1953_v36 = vadd.f32 %v1921_v30, %v1513_v25  ;;  %v1922_v37 = vmax.f32 %v1770_v24, %v1890_v31  ;;  %v1415_v38 = vadd.f32 %v2550_v35, %v3854_v17  ;;  %v1406_v39 = vpop.f32.mrb[17].mxu0  ;;  %v2598_v40 = vpop.f32.mrb[16].mxu1 }
 0x39f   : > { %1987 = vst [vmem:[%s3781_s26 + $0x70] sm:$0xff] %v1955_v33  ;;  %v1956_v41 = vadd.f32 %v1924_v34, %v1516_v29  ;;  %v1407_v42 = vadd.f32 %v3854_v17, %v1406_v39  ;;  %v2551_v43 = vpop.f32.mrb[18].mxu0  ;;  %v1791_v44 = vadd.f32 %v2598_v40, %v3859_v18  ;;  %v1782_v45 = vpop.f32.mrb[17].mxu1 }
 0x3a0   : > { %1985 = vst [vmem:[%s3781_s26 + $0x60] sm:$0xff] %v1953_v36  ;;  %v1954_v46 = vadd.f32 %v1922_v37, %v1514_v32  ;;  %v1487_v47 = vmul.f32 0.01, %v1415_v38  ;;  %v1418_v48 = vadd.f32 %v2551_v43, %v3854_v17  ;;  %v1409_v49 = vpop.f32.mrb[19].mxu0  ;;  %v1783_v50 = vadd.f32 %v3859_v18, %v1782_v45  ;;  %v2599_v51 = vpop.f32.mrb[18].mxu1 }
 0x3a1   : > { %1988 = vst [vmem:[%s3781_s26 + $0x78] sm:$0xff] %v1956_v41  ;;  %v1485_v52 = vmul.f32 0.01, %v1407_v42  ;;  %v1410_v53 = vadd.f32 %v3854_v17, %v1409_v49  ;;  %v1895_v54 = vmul.f32 0.01, %v1791_v44  ;;  %v1794_v55 = vadd.f32 %v2599_v51, %v3859_v18  ;;  %v1785_v56 = vpop.f32.mrb[19].mxu1 }
 0x3a2   : > { %1986 = vst [vmem:[%s3781_s26 + $0x68] sm:$0xff] %v1954_v46  ;;  %v1519_v57 = vmax.f32 %v1415_v38, %v1487_v47  ;;  %v1488_v58 = vmul.f32 0.01, %v1418_v48  ;;  %v1893_v59 = vmul.f32 0.01, %v1783_v50  ;;  %v1786_v60 = vadd.f32 %v3859_v18, %v1785_v56 }
 0x3a3   : > { %v1517_v61 = vmax.f32 %v1407_v42, %v1485_v52  ;;  %v1486_v62 = vmul.f32 0.01, %v1410_v53  ;;  %v1927_v63 = vmax.f32 %v1791_v44, %v1895_v54  ;;  %v1896_v0 = vmul.f32 0.01, %v1794_v55 }
 0x3a4   : > { %v1520_v1 = vmax.f32 %v1418_v48, %v1488_v58  ;;  %v1925_v2 = vmax.f32 %v1783_v50, %v1893_v59  ;;  %v1894_v3 = vmul.f32 0.01, %v1786_v60 }
 0x3a5   : > { %v1518_v4 = vmax.f32 %v1410_v53, %v1486_v62  ;;  %v1959_v5 = vadd.f32 %v1927_v63, %v1519_v57  ;;  %v1928_v6 = vmax.f32 %v1794_v55, %v1896_v0  ;;  %v2554_v7 = vpop.f32.mrb[20].mxu0 }
 0x3a6   : > { %v1957_v8 = vadd.f32 %v1925_v2, %v1517_v61  ;;  %v1926_v9 = vmax.f32 %v1786_v60, %v1894_v3  ;;  %v1431_v10 = vadd.f32 %v2554_v7, %v3854_v17  ;;  %v1422_v11 = vpop.f32.mrb[21].mxu0  ;;  %v2602_v12 = vpop.f32.mrb[20].mxu1 }
 0x3a7   : > { %1991 = vst [vmem:[%s3781_s26 + $0x90] sm:$0xff] %v1959_v5  ;;  %v1960_v13 = vadd.f32 %v1928_v6, %v1520_v1  ;;  %v1423_v14 = vadd.f32 %v3854_v17, %v1422_v11  ;;  %v2555_v15 = vpop.f32.mrb[22].mxu0  ;;  %v1807_v16 = vadd.f32 %v2602_v12, %v3859_v18  ;;  %v1798_v19 = vpop.f32.mrb[21].mxu1 }
 0x3a8   : > { %1989 = vst [vmem:[%s3781_s26 + $0x80] sm:$0xff] %v1957_v8  ;;  %v1958_v20 = vadd.f32 %v1926_v9, %v1518_v4  ;;  %v1491_v21 = vmul.f32 0.01, %v1431_v10  ;;  %v1434_v22 = vadd.f32 %v2555_v15, %v3854_v17  ;;  %v1425_v23 = vpop.f32.mrb[23].mxu0  ;;  %v1799_v24 = vadd.f32 %v3859_v18, %v1798_v19  ;;  %v2603_v25 = vpop.f32.mrb[22].mxu1 }
 0x3a9   : > { %1992 = vst [vmem:[%s3781_s26 + $0x98] sm:$0xff] %v1960_v13  ;;  %v1489_v26 = vmul.f32 0.01, %v1423_v14  ;;  %v1426_v27 = vadd.f32 %v3854_v17, %v1425_v23  ;;  %v1899_v28 = vmul.f32 0.01, %v1807_v16  ;;  %v1810_v29 = vadd.f32 %v2603_v25, %v3859_v18  ;;  %v1801_v30 = vpop.f32.mrb[23].mxu1 }
 0x3aa   : > { %1990 = vst [vmem:[%s3781_s26 + $0x88] sm:$0xff] %v1958_v20  ;;  %v1523_v31 = vmax.f32 %v1431_v10, %v1491_v21  ;;  %v1492_v32 = vmul.f32 0.01, %v1434_v22  ;;  %v1897_v33 = vmul.f32 0.01, %v1799_v24  ;;  %v1802_v34 = vadd.f32 %v3859_v18, %v1801_v30 }
 0x3ab   : > { %v1521_v35 = vmax.f32 %v1423_v14, %v1489_v26  ;;  %v1490_v36 = vmul.f32 0.01, %v1426_v27  ;;  %v1931_v37 = vmax.f32 %v1807_v16, %v1899_v28  ;;  %v1900_v38 = vmul.f32 0.01, %v1810_v29 }
 0x3ac   : > { %v1524_v39 = vmax.f32 %v1434_v22, %v1492_v32  ;;  %v1929_v40 = vmax.f32 %v1799_v24, %v1897_v33  ;;  %v1898_v41 = vmul.f32 0.01, %v1802_v34 }
 0x3ad   : > { %v1522_v42 = vmax.f32 %v1426_v27, %v1490_v36  ;;  %v1963_v43 = vadd.f32 %v1931_v37, %v1523_v31  ;;  %v1932_v44 = vmax.f32 %v1810_v29, %v1900_v38  ;;  %v2558_v45 = vpop.f32.mrb[24].mxu0 }
 0x3ae   : > { %v1961_v46 = vadd.f32 %v1929_v40, %v1521_v35  ;;  %v1930_v47 = vmax.f32 %v1802_v34, %v1898_v41  ;;  %v1447_v48 = vadd.f32 %v2558_v45, %v3854_v17  ;;  %v1438_v49 = vpop.f32.mrb[25].mxu0  ;;  %v2606_v50 = vpop.f32.mrb[24].mxu1 }
 0x3af   : > { %1995 = vst [vmem:[%s3781_s26 + $0xb0] sm:$0xff] %v1963_v43  ;;  %v1964_v51 = vadd.f32 %v1932_v44, %v1524_v39  ;;  %v1439_v52 = vadd.f32 %v3854_v17, %v1438_v49  ;;  %v2559_v53 = vpop.f32.mrb[26].mxu0  ;;  %v1823_v54 = vadd.f32 %v2606_v50, %v3859_v18  ;;  %v1814_v55 = vpop.f32.mrb[25].mxu1 }
 0x3b0   : > { %1993 = vst [vmem:[%s3781_s26 + $0xa0] sm:$0xff] %v1961_v46  ;;  %v1962_v56 = vadd.f32 %v1930_v47, %v1522_v42  ;;  %v1495_v57 = vmul.f32 0.01, %v1447_v48  ;;  %v1450_v58 = vadd.f32 %v2559_v53, %v3854_v17  ;;  %v1441_v59 = vpop.f32.mrb[27].mxu0  ;;  %v1815_v60 = vadd.f32 %v3859_v18, %v1814_v55  ;;  %v2607_v61 = vpop.f32.mrb[26].mxu1 }
 0x3b1   : > { %1996 = vst [vmem:[%s3781_s26 + $0xb8] sm:$0xff] %v1964_v51  ;;  %v1493_v62 = vmul.f32 0.01, %v1439_v52  ;;  %v1442_v63 = vadd.f32 %v3854_v17, %v1441_v59  ;;  %v1903_v0 = vmul.f32 0.01, %v1823_v54  ;;  %v1826_v1 = vadd.f32 %v2607_v61, %v3859_v18  ;;  %v1817_v2 = vpop.f32.mrb[27].mxu1 }
 0x3b2   : > { %1994 = vst [vmem:[%s3781_s26 + $0xa8] sm:$0xff] %v1962_v56  ;;  %v1527_v3 = vmax.f32 %v1447_v48, %v1495_v57  ;;  %v1496_v4 = vmul.f32 0.01, %v1450_v58  ;;  %v1901_v5 = vmul.f32 0.01, %v1815_v60  ;;  %v1818_v6 = vadd.f32 %v3859_v18, %v1817_v2 }
 0x3b3   : > { %v1525_v7 = vmax.f32 %v1439_v52, %v1493_v62  ;;  %v1494_v8 = vmul.f32 0.01, %v1442_v63  ;;  %v1935_v9 = vmax.f32 %v1823_v54, %v1903_v0  ;;  %v1904_v10 = vmul.f32 0.01, %v1826_v1 }
 0x3b4   : > { %v1528_v11 = vmax.f32 %v1450_v58, %v1496_v4  ;;  %v1933_v12 = vmax.f32 %v1815_v60, %v1901_v5  ;;  %v1902_v13 = vmul.f32 0.01, %v1818_v6 }
 0x3b5   : > { %v1526_v14 = vmax.f32 %v1442_v63, %v1494_v8  ;;  %v1967_v15 = vadd.f32 %v1935_v9, %v1527_v3  ;;  %v1936_v16 = vmax.f32 %v1826_v1, %v1904_v10  ;;  %v2562_v19 = vpop.f32.mrb[28].mxu0 }
 0x3b6   : > { %v1965_v20 = vadd.f32 %v1933_v12, %v1525_v7  ;;  %v1934_v21 = vmax.f32 %v1818_v6, %v1902_v13  ;;  %v1463_v22 = vadd.f32 %v2562_v19, %v3854_v17  ;;  %v1454_v23 = vpop.f32.mrb[29].mxu0  ;;  %v2610_v24 = vpop.f32.mrb[28].mxu1 }
 0x3b7   : > { %1999 = vst [vmem:[%s3781_s26 + $0xd0] sm:$0xff] %v1967_v15  ;;  %v1968_v25 = vadd.f32 %v1936_v16, %v1528_v11  ;;  %v1455_v26 = vadd.f32 %v3854_v17, %v1454_v23  ;;  %v2563_v27 = vpop.f32.mrb[30].mxu0  ;;  %v1839_v28 = vadd.f32 %v2610_v24, %v3859_v18  ;;  %v1830_v29 = vpop.f32.mrb[29].mxu1 }
 0x3b8   : > { %1997 = vst [vmem:[%s3781_s26 + $0xc0] sm:$0xff] %v1965_v20  ;;  %v1966_v30 = vadd.f32 %v1934_v21, %v1526_v14  ;;  %v1499_v31 = vmul.f32 0.01, %v1463_v22  ;;  %v1466_v32 = vadd.f32 %v2563_v27, %v3854_v17  ;;  %v1457_v33 = vpop.f32.mrb[31].mxu0  ;;  %v1831_v34 = vadd.f32 %v3859_v18, %v1830_v29  ;;  %v2611_v35 = vpop.f32.mrb[30].mxu1 }
 0x3b9   : > { %2000 = vst [vmem:[%s3781_s26 + $0xd8] sm:$0xff] %v1968_v25  ;;  %v1497_v36 = vmul.f32 0.01, %v1455_v26  ;;  %v1458_v37 = vadd.f32 %v3854_v17, %v1457_v33  ;;  %v1907_v38 = vmul.f32 0.01, %v1839_v28  ;;  %v1842_v39 = vadd.f32 %v2611_v35, %v3859_v18  ;;  %v1833_v40 = vpop.f32.mrb[31].mxu1 }
 0x3ba   : > { %1998 = vst [vmem:[%s3781_s26 + $0xc8] sm:$0xff] %v1966_v30  ;;  %v1531_v41 = vmax.f32 %v1463_v22, %v1499_v31  ;;  %v1500_v42 = vmul.f32 0.01, %v1466_v32  ;;  %v1905_v43 = vmul.f32 0.01, %v1831_v34  ;;  %v1834_v44 = vadd.f32 %v3859_v18, %v1833_v40 }
 0x3bb   : > { %v1529_v45 = vmax.f32 %v1455_v26, %v1497_v36  ;;  %v1498_v46 = vmul.f32 0.01, %v1458_v37  ;;  %v1939_v47 = vmax.f32 %v1839_v28, %v1907_v38  ;;  %v1908_v48 = vmul.f32 0.01, %v1842_v39 }
 0x3bc   : > { %v1532_v49 = vmax.f32 %v1466_v32, %v1500_v42  ;;  %v1937_v17 = vmax.f32 %v1831_v34, %v1905_v43  ;;  %v1906_v50 = vmul.f32 0.01, %v1834_v44 }
 0x3bd   : > { %v1530_v51 = vmax.f32 %v1458_v37, %v1498_v46  ;;  %v1971_v52 = vadd.f32 %v1939_v47, %v1531_v41  ;;  %v1940_v53 = vmax.f32 %v1842_v39, %v1908_v48 }
 0x3be   : > { %v1969_v54 = vadd.f32 %v1937_v17, %v1529_v45  ;;  %v1938_v55 = vmax.f32 %v1834_v44, %v1906_v50 }
 0x3bf   : > { %2003 = vst [vmem:[%s3781_s26 + $0xf0] sm:$0xff] %v1971_v52  ;;  %v1972_v56 = vadd.f32 %v1940_v53, %v1532_v49 }
 0x3c0   : > { %2001 = vst [vmem:[%s3781_s26 + $0xe0] sm:$0xff] %v1969_v54  ;;  %v1970_v57 = vadd.f32 %v1938_v55, %v1530_v51 }
 0x3c1   : > { %2004 = vst [vmem:[%s3781_s26 + $0xf8] sm:$0xff] %v1972_v56 }
 0x3c2   : > { %2002 = vst [vmem:[%s3781_s26 + $0xe8] sm:$0xff] %v1970_v57 }
 0x3c3 PF: > { %s4168_s16 = sld [smem:[#allocation36_spill]]  ;;  %s4169_s6 = sld [smem:[#allocation52_spill]] }
 0x3c4   : > { %s2019_s2 = sshll.u32 %s3781_s26, 4  ;;  %s2006_s1 = scalar_lea.sflag [#allocation9], %s3767_s30  ;;  %s3964_s2 = int_to_ptr.vmem [resolvable:$true] %s2019_s2 }
 0x3c5   : > { %s3068_s4 = scalar_lea.vmem %s3964_s2, 4096  ;;  %p4170_p6 = scmp.ne.s32.totalorder %s4145_s0, 0 }
 0x3c6   : > { %p3069_p2 = scmp.ne.s32.totalorder %s3964_s2, %s3068_s4  ;;  %s3244_s8 = smov [#allocation16]  }
 0x3c7   : > { %s3072_s24 = sshll.u32 %s3244_s8, 4  ;;  %s3073_s24 = int_to_ptr.vmem [resolvable:$false] %s3072_s24 }
 0x3c8   : > { %p3070_p1 = pnand %p3069_p2, %p4170_p6  ;;  %s3074_s20 = scalar_lea.vmem %s3073_s24, 8192 }
 0x3c9   : > { %s2276_s14 = sshll.u32 %s4168_s16, 12  ;;  %p3075_p12 = scmp.lt.s32.totalorder %s3964_s2, %s3073_s24 }
 0x3ca   : > { %s3961_s19 = scalar_lea.hbm %s4169_s6, %s2276_s14  ;;  %p3071_p3 = pneg %p3070_p1 }
 0x3cb   : > { %p3076_p11 = scmp.lt.s32.totalorder %s3074_s20, %s3068_s4 }
 0x3cd   : > { %p3077_p13 = por %p3076_p11, %p3075_p12 }
 0x3cf   : > { %p3078_p8 = pnand %p3077_p13, %p3071_p3 }
 0x3d1   : > { %3081 = shalt.err (!%p3078_p8)
}
 0x3d2   : > { %s3082_s26 = scalar_lea.hbm %s3961_s19, 4096  ;;  %s3086_s15 = scalar_lea.hbm %s4169_s6, 8192 }
 0x3d3   : > { %p3083_p5 = scmp.ne.s32.totalorder %s3961_s19, %s3082_s26  ;;  %p3087_p4 = scmp.lt.u32.totalorder %s3961_s19, %s4169_s6 }
 0x3d4   : > { %p3088_p9 = scmp.lt.u32.totalorder %s3086_s15, %s3082_s26  ;;  %p3090_p2 = scmp.lt.u32.totalorder %s3082_s26, %s3961_s19 }
 0x3d5   : > { %p3084_p0 = pnand %p3083_p5, %p4170_p6 }
 0x3d6   : > { %p3089_p10 = por %p3088_p9, %p3087_p4 }
 0x3d7   : > { %p3085_p7 = pneg %p3084_p0 }
 0x3d8   : > { %p3091_p1 = por %p3090_p2, %p3089_p10 }
 0x3da   : > { %p3092_p3 = pnand %p3091_p1, %p3085_p7 }
 0x3dc   : > { %3095 = shalt.err (!%p3092_p3)
}
 0x3dd   : > { %s3245_s7 = smov 128   ;;  %s3246_s13 = smov 8  }
 0x3de   : > { %2648 = dma.vmem_to_hbm [thread:$0]  (%p4170_p6), %s3964_s2, 4096, %s3961_s19, %s2006_s1, %s3245_s7, %s3245_s7, %s3246_s13  }
 0x3df PF: > { %s4171_s9 = sld [smem:[#allocation29_spill]]  ;;  %p2682_p12 = scmp.ge.s32.totalorder %s3228_s23, 2 }
 0x3e0   : > { %p4172_p11 = scmp.ne.s32.totalorder %s4147_s21, 0 }
 0x3e2   : > { %p2674_p13 = pnand %p2682_p12, %p4172_p11 }
 0x3e5   : > { %s2034_s3 = sand.u32 1, %s4171_s9  }
 0x3e6   : > { %s2035_s11 = scalar_lea.sflag [#allocation9], %s2034_s3 }
 0x3e7   : > { %3171 = dma.done.wait (!%p2674_p13), %s2035_s11, 4096  }
 0x3e8   : > { %3173 = vsyncadd (!%p2674_p13), %s2035_s11, 4294963200  ;;  %s42_s23 = sadd.s32 1, %s3228_s23   ;;  %s4174_s2 = sld [smem:[#allocation30_spill]] }
 0x3e9   : > { %p3995_p8 = scmp.ge.s32.totalorder %s42_s23, 6   ;;  %s4175_s11 = sld [smem:[#allocation31_spill]] }
 0x3ea   : > { %s4176_s13 = sld [smem:[#allocation32_spill]]  ;;  %s4177_s14 = sld [smem:[#allocation33_spill]] }
 0x3eb   : > { %s4178_s15 = sld [smem:[#allocation43_spill]]  ;;  %s4179_s0 = sld [smem:[#allocation34_spill]] }
 0x3ec   : > { %s4180_s18 = sld [smem:[#allocation44_spill]]  ;;  %s4181_s19 = sld [smem:[#allocation37_spill]] }
 0x3ed   : > { %s4182_s20 = sld [smem:[#allocation38_spill]]  ;;  %s4183_s21 = sld [smem:[#allocation40_spill]] }
 0x3ee   : > { %s4184_s22 = sld [smem:[#allocation41_spill]]  ;;  %s4186_s12 = smov %s3674_s25 }
 0x3ef   : > { %s4187_s16 = smov %s3204_s17  ;;  %41 = sbr.rel (!%p3995_p8) target bundleno = 49 (0x31), region = 137 }
 0x3f1   : > { %s4188_s17 = smov %s4179_s0 }
 0x3f6   :  { %2040 = vsyncpa [#allocation8], 1 }
 0x3f7   :  { %2042 = vsyncpa [#allocation8 + $0x1], 1 }
 0x3f8   :  { %2043 = vsyncpa [#allocation11], 1 }
 0x3f9   :  { %2045 = vsyncpa [#allocation11 + $0x1], 1 }
 0x3fa   :  { %2046 = vsyncpa [#allocation14], 1 }
 0x3fb   :  { %2047 = vsyncpa [#allocation9], 1 }
 0x3fc   :  { %2049 = vsyncpa [#allocation9 + $0x1], 1 }

</bundles_post_ra>
